<compile_context>
chip_gen: v5e
topology: v5e:2x2
jax: 0.10.0
libtpu: 0.0.40
codegen_flags: <defaults>
</compile_context>

<pallas_src>
import functools

import jax
import jax.numpy as jnp
from jax.experimental import pallas as pl
from jax.experimental.pallas import tpu as pltpu

_MASK_VALUE = -1e30  # python float, host-side only (representable in bf16)


def _gat_layer(x, w_ref, att_ref, b_ref, mask_bias, *, heads, f_out,
               mxu_dtype, softmax_dtype):
    """One GATConv layer (PyG semantics, dropout off). Returns [N, H*F_out] f32.

    x         : [N, F_in]  f32 value (already loaded)
    w_ref     : [F_in, H*F_out]
    att_ref   : [H*F_out, 2H]  block-diag [att_src | att_dst] projection
    b_ref     : [1, H*F_out]
    mask_bias : [N, N] softmax_dtype, 0 where edge src j -> dst i, -1e30 else
    """
    n = x.shape[0]
    w = w_ref[...].astype(mxu_dtype)
    h = jnp.dot(x.astype(mxu_dtype), w,
                preferred_element_type=jnp.float32)               # [N, H*F_out]
    h_mx = h.astype(mxu_dtype)

    # Combined src/dst attention logits in one MXU pass: a = h @ [As | Ad].
    a = jnp.dot(h_mx, att_ref[...].astype(mxu_dtype),
                preferred_element_type=jnp.float32)               # [N, 2H]
    a_src_t = jnp.transpose(a[:, :heads]).astype(softmax_dtype)   # [H, N]
    a_dst = a[:, heads:2 * heads].astype(softmax_dtype)           # [N, H]

    # Ones column appended to the aggregation RHS: the softmax denominator is
    # produced by the MXU instead of an XLU cross-lane reduction.
    ones_col = jnp.ones((n, 1), mxu_dtype)

    head_outs = []
    for hd in range(heads):
        # e[i, j] = LeakyReLU(a_dst[i] + a_src[j], 0.2) + mask_bias[i, j]
        e = a_dst[:, hd:hd + 1] + a_src_t[hd:hd + 1, :]           # [N, N]
        e = jnp.where(e > 0, e, 0.2 * e)
        e = e + mask_bias
        # Masked softmax over source nodes j (self-loops keep every row alive).
        m = jnp.max(e, axis=1, keepdims=True)
        p = jnp.exp(e - m).astype(mxu_dtype)                      # [N, N]
        rhs = jnp.concatenate(
            [h_mx[:, hd * f_out:(hd + 1) * f_out], ones_col], axis=1)
        agg_den = jnp.dot(p, rhs, preferred_element_type=jnp.float32)
        agg = agg_den[:, :f_out]                                  # [N, F_out]
        denom = agg_den[:, f_out:f_out + 1]                       # [N, 1]
        head_outs.append(agg * pl.reciprocal(denom, approx=True))

    # Lane-dense result: one full-width [N, H*F_out] slab, bias added once.
    return jnp.concatenate(head_outs, axis=1) + b_ref[...]


def _gat_module_kernel(x_ref, bias_ref, w1_ref, att1_ref, b1_ref,
                       w2_ref, att2_ref, b2_ref, out_ref,
                       *, heads1, f1, heads2, f2, mxu_dtype, softmax_dtype):
    """Both GATConv layers fused; h1 never leaves VMEM (held as a value)."""
    mask_bias = bias_ref[...].astype(softmax_dtype)               # [N, N]
    h1 = _gat_layer(x_ref[...], w1_ref, att1_ref, b1_ref, mask_bias,
                    heads=heads1, f_out=f1, mxu_dtype=mxu_dtype,
                    softmax_dtype=softmax_dtype)
    out = _gat_layer(h1, w2_ref, att2_ref, b2_ref, mask_bias,
                     heads=heads2, f_out=f2, mxu_dtype=mxu_dtype,
                     softmax_dtype=softmax_dtype)
    out_ref[...] = out.astype(out_ref.dtype)


def _block_diag_att(att_src, att_dst):
    """[H, F_out] x 2 -> block-diagonal [H*F_out, 2H] so per-head logits for
    both src and dst come from a single matmul inside the kernel."""
    heads, f_out = att_src.shape
    att = jnp.zeros((heads * f_out, 2 * heads), jnp.float32)
    for hd in range(heads):
        att = att.at[hd * f_out:(hd + 1) * f_out, hd].set(att_src[hd])
        att = att.at[hd * f_out:(hd + 1) * f_out, heads + hd].set(att_dst[hd])
    return att


def build_mask_bias(edge_index, num_nodes):
    """Additive softmax mask (host precomputed, bf16): 0 where edge src j ->
    dst i exists (plus deduped self loops), -1e30 elsewhere."""
    src, dst = edge_index[0], edge_index[1]
    adj = jnp.zeros((num_nodes, num_nodes), jnp.bool_)
    adj = adj.at[dst, src].set(True)
    diag = jnp.arange(num_nodes)
    adj = adj.at[diag, diag].set(True)
    return jnp.where(adj, 0.0, _MASK_VALUE).astype(jnp.bfloat16)


def _default_softmax_dtype():
    """bf16 softmax intermediates where the VPU/EUP support bf16 (v6e/v7x);
    f32 on older generations (v5e and earlier)."""
    try:
        kind = jax.devices()[0].device_kind.lower()
    except Exception:
        return jnp.float32
    for old in ("v2", "v3", "v4", "v5"):
        if old in kind:
            return jnp.float32
    return jnp.bfloat16


def _physical_vmem_bytes():
    try:
        return int(pltpu.get_tpu_info().vmem_capacity_bytes)
    except Exception:
        return 64 * 1024 * 1024  # conservative: v7x per-TC VMEM


def _vmem_limit_bytes(n, inputs, out_bytes, h1_bytes):
    input_bytes = sum(int(a.size) * a.dtype.itemsize for a in inputs)
    temp_bytes = 4 * n * n * 4          # headroom for live N^2 softmax temps
    need = int(1.5 * (input_bytes + out_bytes + h1_bytes + temp_bytes))
    phys = _physical_vmem_bytes()
    return max(min(need, int(phys * 0.9)), 32 * 1024 * 1024)


def gat_module_forward(params, x, edge_index, *, mxu_dtype=jnp.bfloat16,
                       softmax_dtype=None):
    if softmax_dtype is None:
        softmax_dtype = _default_softmax_dtype()

    n, f_in = x.shape
    heads1, f1 = params["att_src1"].shape
    heads2, f2 = params["att_src2"].shape

    mask_bias = build_mask_bias(edge_index, n)
    att1 = _block_diag_att(params["att_src1"], params["att_dst1"])
    att2 = _block_diag_att(params["att_src2"], params["att_dst2"])
    b1 = params["b1"].reshape(1, -1)
    b2 = params["b2"].reshape(1, -1)

    inputs = (x, mask_bias, params["w1"], att1, b1, params["w2"], att2, b2)
    out_bytes = n * heads2 * f2 * 4
    out_shape = jax.ShapeDtypeStruct((n, heads2 * f2), jnp.float32)

    # Advisory cost estimate so XLA schedules neighbors around the call.
    flops = 0
    for fi, h, fo in ((f_in, heads1, f1), (heads1 * f1, heads2, f2)):
        flops += 2 * n * fi * h * fo              # feature projection
        flops += 2 * n * (h * fo) * 2 * h         # attention logits
        flops += 2 * h * n * n * (fo + 1)         # aggregation (+denom column)
    transcendentals = (heads1 + heads2) * n * n
    bytes_accessed = (sum(int(a.size) * a.dtype.itemsize for a in inputs)
                      + out_bytes)

    kernel = functools.partial(_gat_module_kernel, heads1=heads1, f1=f1,
                               heads2=heads2, f2=f2, mxu_dtype=mxu_dtype,
                               softmax_dtype=softmax_dtype)
    vmem = pl.BlockSpec(memory_space=pltpu.MemorySpace.VMEM)

    return pl.pallas_call(
        kernel,
        out_shape=out_shape,
        in_specs=[vmem] * len(inputs),
        out_specs=vmem,
        compiler_params=pltpu.CompilerParams(
            vmem_limit_bytes=_vmem_limit_bytes(n, inputs, out_bytes,
                                               n * heads1 * f1 * 4)),
        cost_estimate=pl.CostEstimate(flops=flops,
                                      transcendentals=transcendentals,
                                      bytes_accessed=bytes_accessed),
    )(*inputs)


def init_gat_module_params(key, emb_dim, gat_heads=8):
    """Deterministic (glorot-style) init matching GATConv parameter shapes."""
    f1 = emb_dim // gat_heads
    ks = jax.random.split(key, 6)

    def glorot(k, shape):
        fan_in, fan_out = shape[0], shape[-1]
        scale = jnp.sqrt(6.0 / (fan_in + fan_out))
        return jax.random.uniform(k, shape, jnp.float32, -scale, scale)

    return {
        # gat1: in=emb_dim, out=emb_dim//heads, heads=gat_heads, concat
        "w1": glorot(ks[0], (emb_dim, gat_heads * f1)),
        "att_src1": glorot(ks[1], (gat_heads, f1)),
        "att_dst1": glorot(ks[2], (gat_heads, f1)),
        "b1": jnp.zeros((gat_heads * f1,), jnp.float32),
        # gat2: in=emb_dim, out=emb_dim, heads=1
        "w2": glorot(ks[3], (emb_dim, emb_dim)),
        "att_src2": glorot(ks[4], (1, emb_dim)),
        "att_dst2": glorot(ks[5], (1, emb_dim)),
        "b2": jnp.zeros((emb_dim,), jnp.float32),
    }


if __name__ == "__main__":
    key = jax.random.PRNGKey(0)
    k_x, k_e1, k_e2, k_p = jax.random.split(key, 4)

    N, EMB_DIM, HEADS, E = 16, 32, 8, 40
    x = jax.random.normal(k_x, (N, EMB_DIM), jnp.float32)
    src = jax.random.randint(k_e1, (E,), 0, N)
    dst = jax.random.randint(k_e2, (E,), 0, N)
    edge_index = jnp.stack([src, dst], axis=0)          # [2, E]

    params = init_gat_module_params(k_p, EMB_DIM, HEADS)

    out = gat_module_forward(params, x, edge_index)
    out = jax.block_until_ready(out)
    assert out.shape == (N, EMB_DIM), out.shape
    assert bool(jnp.all(jnp.isfinite(out)))
    print("KERNEL_OK")
</pallas_src>

<mosaic_0001>
module attributes {stable_mosaic.version = 11 : i64} {
  func.func @_gat_module_kernel(%arg0: memref<16x32xf32, #tpu.memory_space<vmem>>, %arg1: memref<16x16xbf16, #tpu.memory_space<vmem>>, %arg2: memref<32x32xf32, #tpu.memory_space<vmem>>, %arg3: memref<32x16xf32, #tpu.memory_space<vmem>>, %arg4: memref<1x32xf32, #tpu.memory_space<vmem>>, %arg5: memref<32x32xf32, #tpu.memory_space<vmem>>, %arg6: memref<32x2xf32, #tpu.memory_space<vmem>>, %arg7: memref<1x32xf32, #tpu.memory_space<vmem>>, %arg8: memref<16x32xf32, #tpu.memory_space<vmem>>) attributes {dimension_semantics = [], scalar_prefetch = 0 : i64, scratch_operands = 0 : i64, tpu.core_type = #tpu.core_type<tc>} {
    %c0 = arith.constant 0 : index
    %c0_0 = arith.constant 0 : index
    %0 = vector.load %arg1[%c0, %c0_0] : memref<16x16xbf16, #tpu.memory_space<vmem>>, vector<16x16xbf16>
    %c0_1 = arith.constant 0 : index
    %c0_2 = arith.constant 0 : index
    %1 = vector.load %arg0[%c0_1, %c0_2] : memref<16x32xf32, #tpu.memory_space<vmem>>, vector<16x32xf32>
    %c0_3 = arith.constant 0 : index
    %c0_4 = arith.constant 0 : index
    %2 = vector.load %arg2[%c0_3, %c0_4] : memref<32x32xf32, #tpu.memory_space<vmem>>, vector<32x32xf32>
    %3 = arith.truncf %2 : vector<32x32xf32> to vector<32x32xbf16>
    %4 = arith.truncf %1 : vector<16x32xf32> to vector<16x32xbf16>
    %cst = arith.constant dense<0.000000e+00> : vector<16x32xf32>
    %5 = tpu.matmul %4, %3, %cst {dimension_numbers = #tpu.dot_dimension_numbers<[1], [0], [0], [1], [0, 0, 1, 1], [], []>} : vector<16x32xbf16>, vector<32x32xbf16>, vector<16x32xf32> -> vector<16x32xf32>
    %6 = arith.truncf %5 : vector<16x32xf32> to vector<16x32xbf16>
    %c0_5 = arith.constant 0 : index
    %c0_6 = arith.constant 0 : index
    %7 = vector.load %arg3[%c0_5, %c0_6] : memref<32x16xf32, #tpu.memory_space<vmem>>, vector<32x16xf32>
    %8 = arith.truncf %7 : vector<32x16xf32> to vector<32x16xbf16>
    %cst_7 = arith.constant dense<0.000000e+00> : vector<16x16xf32>
    %9 = tpu.matmul %6, %8, %cst_7 {dimension_numbers = #tpu.dot_dimension_numbers<[1], [0], [0], [1], [0, 0, 1, 1], [], []>} : vector<16x32xbf16>, vector<32x16xbf16>, vector<16x16xf32> -> vector<16x16xf32>
    %10 = vector.extract_strided_slice %9 {offsets = [0, 0], sizes = [16, 8], strides = [1, 1]} : vector<16x16xf32> to vector<16x8xf32>
    %11 = tpu.transpose %10, [1, 0] : vector<16x8xf32> -> vector<8x16xf32>
    %12 = arith.truncf %11 : vector<8x16xf32> to vector<8x16xbf16>
    %13 = vector.extract_strided_slice %9 {offsets = [0, 8], sizes = [16, 8], strides = [1, 1]} : vector<16x16xf32> to vector<16x8xf32>
    %14 = arith.truncf %13 : vector<16x8xf32> to vector<16x8xbf16>
    %cst_8 = arith.constant 1.000000e+00 : bf16
    %15 = vector.broadcast %cst_8 : bf16 to vector<16x1xbf16>
    %16 = vector.extract_strided_slice %14 {offsets = [0, 0], sizes = [16, 1], strides = [1, 1]} : vector<16x8xbf16> to vector<16x1xbf16>
    %17 = vector.extract_strided_slice %12 {offsets = [0, 0], sizes = [1, 16], strides = [1, 1]} : vector<8x16xbf16> to vector<1x16xbf16>
    %18 = vector.broadcast %16 : vector<16x1xbf16> to vector<16x16xbf16>
    %19 = vector.broadcast %17 : vector<1x16xbf16> to vector<16x16xbf16>
    %20 = arith.addf %18, %19 : vector<16x16xbf16>
    %cst_9 = arith.constant 0.000000e+00 : bf16
    %21 = vector.broadcast %cst_9 : bf16 to vector<16x16xbf16>
    %22 = arith.cmpf ogt, %20, %21 : vector<16x16xbf16>
    %cst_10 = arith.constant 2.001950e-01 : bf16
    %23 = vector.broadcast %cst_10 : bf16 to vector<16x16xbf16>
    %24 = arith.mulf %23, %20 : vector<16x16xbf16>
    %25 = arith.select %22, %20, %24 : vector<16x16xi1>, vector<16x16xbf16>
    %26 = arith.addf %25, %0 : vector<16x16xbf16>
    %cst_11 = arith.constant dense<0xFF80> : vector<16xbf16>
    %27 = vector.multi_reduction <maximumf>, %26, %cst_11 [1] : vector<16x16xbf16> to vector<16xbf16>
    %28 = vector.shape_cast %27 : vector<16xbf16> to vector<16x1xbf16>
    %29 = vector.broadcast %28 : vector<16x1xbf16> to vector<16x16xbf16>
    %30 = arith.subf %26, %29 : vector<16x16xbf16>
    %31 = math.exp %30 : vector<16x16xbf16>
    %32 = vector.extract_strided_slice %6 {offsets = [0, 0], sizes = [16, 4], strides = [1, 1]} : vector<16x32xbf16> to vector<16x4xbf16>
    %33 = tpu.concatenate %32, %15 in 1 : vector<16x4xbf16>, vector<16x1xbf16> -> vector<16x5xbf16>
    %cst_12 = arith.constant dense<0.000000e+00> : vector<16x5xf32>
    %34 = tpu.matmul %31, %33, %cst_12 {dimension_numbers = #tpu.dot_dimension_numbers<[1], [0], [0], [1], [0, 0, 1, 1], [], []>} : vector<16x16xbf16>, vector<16x5xbf16>, vector<16x5xf32> -> vector<16x5xf32>
    %35 = vector.extract_strided_slice %34 {offsets = [0, 0], sizes = [16, 4], strides = [1, 1]} : vector<16x5xf32> to vector<16x4xf32>
    %36 = vector.extract_strided_slice %34 {offsets = [0, 4], sizes = [16, 1], strides = [1, 1]} : vector<16x5xf32> to vector<16x1xf32>
    %37 = tpu.reciprocal %36 {approx = true} : vector<16x1xf32> -> vector<16x1xf32>
    %38 = vector.broadcast %37 : vector<16x1xf32> to vector<16x4xf32>
    %39 = arith.mulf %35, %38 : vector<16x4xf32>
    %40 = vector.extract_strided_slice %14 {offsets = [0, 1], sizes = [16, 1], strides = [1, 1]} : vector<16x8xbf16> to vector<16x1xbf16>
    %41 = vector.extract_strided_slice %12 {offsets = [1, 0], sizes = [1, 16], strides = [1, 1]} : vector<8x16xbf16> to vector<1x16xbf16>
    %42 = vector.broadcast %40 : vector<16x1xbf16> to vector<16x16xbf16>
    %43 = vector.broadcast %41 : vector<1x16xbf16> to vector<16x16xbf16>
    %44 = arith.addf %42, %43 : vector<16x16xbf16>
    %cst_13 = arith.constant 0.000000e+00 : bf16
    %45 = vector.broadcast %cst_13 : bf16 to vector<16x16xbf16>
    %46 = arith.cmpf ogt, %44, %45 : vector<16x16xbf16>
    %cst_14 = arith.constant 2.001950e-01 : bf16
    %47 = vector.broadcast %cst_14 : bf16 to vector<16x16xbf16>
    %48 = arith.mulf %47, %44 : vector<16x16xbf16>
    %49 = arith.select %46, %44, %48 : vector<16x16xi1>, vector<16x16xbf16>
    %50 = arith.addf %49, %0 : vector<16x16xbf16>
    %cst_15 = arith.constant dense<0xFF80> : vector<16xbf16>
    %51 = vector.multi_reduction <maximumf>, %50, %cst_15 [1] : vector<16x16xbf16> to vector<16xbf16>
    %52 = vector.shape_cast %51 : vector<16xbf16> to vector<16x1xbf16>
    %53 = vector.broadcast %52 : vector<16x1xbf16> to vector<16x16xbf16>
    %54 = arith.subf %50, %53 : vector<16x16xbf16>
    %55 = math.exp %54 : vector<16x16xbf16>
    %56 = vector.extract_strided_slice %6 {offsets = [0, 4], sizes = [16, 4], strides = [1, 1]} : vector<16x32xbf16> to vector<16x4xbf16>
    %57 = tpu.concatenate %56, %15 in 1 : vector<16x4xbf16>, vector<16x1xbf16> -> vector<16x5xbf16>
    %cst_16 = arith.constant dense<0.000000e+00> : vector<16x5xf32>
    %58 = tpu.matmul %55, %57, %cst_16 {dimension_numbers = #tpu.dot_dimension_numbers<[1], [0], [0], [1], [0, 0, 1, 1], [], []>} : vector<16x16xbf16>, vector<16x5xbf16>, vector<16x5xf32> -> vector<16x5xf32>
    %59 = vector.extract_strided_slice %58 {offsets = [0, 0], sizes = [16, 4], strides = [1, 1]} : vector<16x5xf32> to vector<16x4xf32>
    %60 = vector.extract_strided_slice %58 {offsets = [0, 4], sizes = [16, 1], strides = [1, 1]} : vector<16x5xf32> to vector<16x1xf32>
    %61 = tpu.reciprocal %60 {approx = true} : vector<16x1xf32> -> vector<16x1xf32>
    %62 = vector.broadcast %61 : vector<16x1xf32> to vector<16x4xf32>
    %63 = arith.mulf %59, %62 : vector<16x4xf32>
    %64 = vector.extract_strided_slice %14 {offsets = [0, 2], sizes = [16, 1], strides = [1, 1]} : vector<16x8xbf16> to vector<16x1xbf16>
    %65 = vector.extract_strided_slice %12 {offsets = [2, 0], sizes = [1, 16], strides = [1, 1]} : vector<8x16xbf16> to vector<1x16xbf16>
    %66 = vector.broadcast %64 : vector<16x1xbf16> to vector<16x16xbf16>
    %67 = vector.broadcast %65 : vector<1x16xbf16> to vector<16x16xbf16>
    %68 = arith.addf %66, %67 : vector<16x16xbf16>
    %cst_17 = arith.constant 0.000000e+00 : bf16
    %69 = vector.broadcast %cst_17 : bf16 to vector<16x16xbf16>
    %70 = arith.cmpf ogt, %68, %69 : vector<16x16xbf16>
    %cst_18 = arith.constant 2.001950e-01 : bf16
    %71 = vector.broadcast %cst_18 : bf16 to vector<16x16xbf16>
    %72 = arith.mulf %71, %68 : vector<16x16xbf16>
    %73 = arith.select %70, %68, %72 : vector<16x16xi1>, vector<16x16xbf16>
    %74 = arith.addf %73, %0 : vector<16x16xbf16>
    %cst_19 = arith.constant dense<0xFF80> : vector<16xbf16>
    %75 = vector.multi_reduction <maximumf>, %74, %cst_19 [1] : vector<16x16xbf16> to vector<16xbf16>
    %76 = vector.shape_cast %75 : vector<16xbf16> to vector<16x1xbf16>
    %77 = vector.broadcast %76 : vector<16x1xbf16> to vector<16x16xbf16>
    %78 = arith.subf %74, %77 : vector<16x16xbf16>
    %79 = math.exp %78 : vector<16x16xbf16>
    %80 = vector.extract_strided_slice %6 {offsets = [0, 8], sizes = [16, 4], strides = [1, 1]} : vector<16x32xbf16> to vector<16x4xbf16>
    %81 = tpu.concatenate %80, %15 in 1 : vector<16x4xbf16>, vector<16x1xbf16> -> vector<16x5xbf16>
    %cst_20 = arith.constant dense<0.000000e+00> : vector<16x5xf32>
    %82 = tpu.matmul %79, %81, %cst_20 {dimension_numbers = #tpu.dot_dimension_numbers<[1], [0], [0], [1], [0, 0, 1, 1], [], []>} : vector<16x16xbf16>, vector<16x5xbf16>, vector<16x5xf32> -> vector<16x5xf32>
    %83 = vector.extract_strided_slice %82 {offsets = [0, 0], sizes = [16, 4], strides = [1, 1]} : vector<16x5xf32> to vector<16x4xf32>
    %84 = vector.extract_strided_slice %82 {offsets = [0, 4], sizes = [16, 1], strides = [1, 1]} : vector<16x5xf32> to vector<16x1xf32>
    %85 = tpu.reciprocal %84 {approx = true} : vector<16x1xf32> -> vector<16x1xf32>
    %86 = vector.broadcast %85 : vector<16x1xf32> to vector<16x4xf32>
    %87 = arith.mulf %83, %86 : vector<16x4xf32>
    %88 = vector.extract_strided_slice %14 {offsets = [0, 3], sizes = [16, 1], strides = [1, 1]} : vector<16x8xbf16> to vector<16x1xbf16>
    %89 = vector.extract_strided_slice %12 {offsets = [3, 0], sizes = [1, 16], strides = [1, 1]} : vector<8x16xbf16> to vector<1x16xbf16>
    %90 = vector.broadcast %88 : vector<16x1xbf16> to vector<16x16xbf16>
    %91 = vector.broadcast %89 : vector<1x16xbf16> to vector<16x16xbf16>
    %92 = arith.addf %90, %91 : vector<16x16xbf16>
    %cst_21 = arith.constant 0.000000e+00 : bf16
    %93 = vector.broadcast %cst_21 : bf16 to vector<16x16xbf16>
    %94 = arith.cmpf ogt, %92, %93 : vector<16x16xbf16>
    %cst_22 = arith.constant 2.001950e-01 : bf16
    %95 = vector.broadcast %cst_22 : bf16 to vector<16x16xbf16>
    %96 = arith.mulf %95, %92 : vector<16x16xbf16>
    %97 = arith.select %94, %92, %96 : vector<16x16xi1>, vector<16x16xbf16>
    %98 = arith.addf %97, %0 : vector<16x16xbf16>
    %cst_23 = arith.constant dense<0xFF80> : vector<16xbf16>
    %99 = vector.multi_reduction <maximumf>, %98, %cst_23 [1] : vector<16x16xbf16> to vector<16xbf16>
    %100 = vector.shape_cast %99 : vector<16xbf16> to vector<16x1xbf16>
    %101 = vector.broadcast %100 : vector<16x1xbf16> to vector<16x16xbf16>
    %102 = arith.subf %98, %101 : vector<16x16xbf16>
    %103 = math.exp %102 : vector<16x16xbf16>
    %104 = vector.extract_strided_slice %6 {offsets = [0, 12], sizes = [16, 4], strides = [1, 1]} : vector<16x32xbf16> to vector<16x4xbf16>
    %105 = tpu.concatenate %104, %15 in 1 : vector<16x4xbf16>, vector<16x1xbf16> -> vector<16x5xbf16>
    %cst_24 = arith.constant dense<0.000000e+00> : vector<16x5xf32>
    %106 = tpu.matmul %103, %105, %cst_24 {dimension_numbers = #tpu.dot_dimension_numbers<[1], [0], [0], [1], [0, 0, 1, 1], [], []>} : vector<16x16xbf16>, vector<16x5xbf16>, vector<16x5xf32> -> vector<16x5xf32>
    %107 = vector.extract_strided_slice %106 {offsets = [0, 0], sizes = [16, 4], strides = [1, 1]} : vector<16x5xf32> to vector<16x4xf32>
    %108 = vector.extract_strided_slice %106 {offsets = [0, 4], sizes = [16, 1], strides = [1, 1]} : vector<16x5xf32> to vector<16x1xf32>
    %109 = tpu.reciprocal %108 {approx = true} : vector<16x1xf32> -> vector<16x1xf32>
    %110 = vector.broadcast %109 : vector<16x1xf32> to vector<16x4xf32>
    %111 = arith.mulf %107, %110 : vector<16x4xf32>
    %112 = vector.extract_strided_slice %14 {offsets = [0, 4], sizes = [16, 1], strides = [1, 1]} : vector<16x8xbf16> to vector<16x1xbf16>
    %113 = vector.extract_strided_slice %12 {offsets = [4, 0], sizes = [1, 16], strides = [1, 1]} : vector<8x16xbf16> to vector<1x16xbf16>
    %114 = vector.broadcast %112 : vector<16x1xbf16> to vector<16x16xbf16>
    %115 = vector.broadcast %113 : vector<1x16xbf16> to vector<16x16xbf16>
    %116 = arith.addf %114, %115 : vector<16x16xbf16>
    %cst_25 = arith.constant 0.000000e+00 : bf16
    %117 = vector.broadcast %cst_25 : bf16 to vector<16x16xbf16>
    %118 = arith.cmpf ogt, %116, %117 : vector<16x16xbf16>
    %cst_26 = arith.constant 2.001950e-01 : bf16
    %119 = vector.broadcast %cst_26 : bf16 to vector<16x16xbf16>
    %120 = arith.mulf %119, %116 : vector<16x16xbf16>
    %121 = arith.select %118, %116, %120 : vector<16x16xi1>, vector<16x16xbf16>
    %122 = arith.addf %121, %0 : vector<16x16xbf16>
    %cst_27 = arith.constant dense<0xFF80> : vector<16xbf16>
    %123 = vector.multi_reduction <maximumf>, %122, %cst_27 [1] : vector<16x16xbf16> to vector<16xbf16>
    %124 = vector.shape_cast %123 : vector<16xbf16> to vector<16x1xbf16>
    %125 = vector.broadcast %124 : vector<16x1xbf16> to vector<16x16xbf16>
    %126 = arith.subf %122, %125 : vector<16x16xbf16>
    %127 = math.exp %126 : vector<16x16xbf16>
    %128 = vector.extract_strided_slice %6 {offsets = [0, 16], sizes = [16, 4], strides = [1, 1]} : vector<16x32xbf16> to vector<16x4xbf16>
    %129 = tpu.concatenate %128, %15 in 1 : vector<16x4xbf16>, vector<16x1xbf16> -> vector<16x5xbf16>
    %cst_28 = arith.constant dense<0.000000e+00> : vector<16x5xf32>
    %130 = tpu.matmul %127, %129, %cst_28 {dimension_numbers = #tpu.dot_dimension_numbers<[1], [0], [0], [1], [0, 0, 1, 1], [], []>} : vector<16x16xbf16>, vector<16x5xbf16>, vector<16x5xf32> -> vector<16x5xf32>
    %131 = vector.extract_strided_slice %130 {offsets = [0, 0], sizes = [16, 4], strides = [1, 1]} : vector<16x5xf32> to vector<16x4xf32>
    %132 = vector.extract_strided_slice %130 {offsets = [0, 4], sizes = [16, 1], strides = [1, 1]} : vector<16x5xf32> to vector<16x1xf32>
    %133 = tpu.reciprocal %132 {approx = true} : vector<16x1xf32> -> vector<16x1xf32>
    %134 = vector.broadcast %133 : vector<16x1xf32> to vector<16x4xf32>
    %135 = arith.mulf %131, %134 : vector<16x4xf32>
    %136 = vector.extract_strided_slice %14 {offsets = [0, 5], sizes = [16, 1], strides = [1, 1]} : vector<16x8xbf16> to vector<16x1xbf16>
    %137 = vector.extract_strided_slice %12 {offsets = [5, 0], sizes = [1, 16], strides = [1, 1]} : vector<8x16xbf16> to vector<1x16xbf16>
    %138 = vector.broadcast %136 : vector<16x1xbf16> to vector<16x16xbf16>
    %139 = vector.broadcast %137 : vector<1x16xbf16> to vector<16x16xbf16>
    %140 = arith.addf %138, %139 : vector<16x16xbf16>
    %cst_29 = arith.constant 0.000000e+00 : bf16
    %141 = vector.broadcast %cst_29 : bf16 to vector<16x16xbf16>
    %142 = arith.cmpf ogt, %140, %141 : vector<16x16xbf16>
    %cst_30 = arith.constant 2.001950e-01 : bf16
    %143 = vector.broadcast %cst_30 : bf16 to vector<16x16xbf16>
    %144 = arith.mulf %143, %140 : vector<16x16xbf16>
    %145 = arith.select %142, %140, %144 : vector<16x16xi1>, vector<16x16xbf16>
    %146 = arith.addf %145, %0 : vector<16x16xbf16>
    %cst_31 = arith.constant dense<0xFF80> : vector<16xbf16>
    %147 = vector.multi_reduction <maximumf>, %146, %cst_31 [1] : vector<16x16xbf16> to vector<16xbf16>
    %148 = vector.shape_cast %147 : vector<16xbf16> to vector<16x1xbf16>
    %149 = vector.broadcast %148 : vector<16x1xbf16> to vector<16x16xbf16>
    %150 = arith.subf %146, %149 : vector<16x16xbf16>
    %151 = math.exp %150 : vector<16x16xbf16>
    %152 = vector.extract_strided_slice %6 {offsets = [0, 20], sizes = [16, 4], strides = [1, 1]} : vector<16x32xbf16> to vector<16x4xbf16>
    %153 = tpu.concatenate %152, %15 in 1 : vector<16x4xbf16>, vector<16x1xbf16> -> vector<16x5xbf16>
    %cst_32 = arith.constant dense<0.000000e+00> : vector<16x5xf32>
    %154 = tpu.matmul %151, %153, %cst_32 {dimension_numbers = #tpu.dot_dimension_numbers<[1], [0], [0], [1], [0, 0, 1, 1], [], []>} : vector<16x16xbf16>, vector<16x5xbf16>, vector<16x5xf32> -> vector<16x5xf32>
    %155 = vector.extract_strided_slice %154 {offsets = [0, 0], sizes = [16, 4], strides = [1, 1]} : vector<16x5xf32> to vector<16x4xf32>
    %156 = vector.extract_strided_slice %154 {offsets = [0, 4], sizes = [16, 1], strides = [1, 1]} : vector<16x5xf32> to vector<16x1xf32>
    %157 = tpu.reciprocal %156 {approx = true} : vector<16x1xf32> -> vector<16x1xf32>
    %158 = vector.broadcast %157 : vector<16x1xf32> to vector<16x4xf32>
    %159 = arith.mulf %155, %158 : vector<16x4xf32>
    %160 = vector.extract_strided_slice %14 {offsets = [0, 6], sizes = [16, 1], strides = [1, 1]} : vector<16x8xbf16> to vector<16x1xbf16>
    %161 = vector.extract_strided_slice %12 {offsets = [6, 0], sizes = [1, 16], strides = [1, 1]} : vector<8x16xbf16> to vector<1x16xbf16>
    %162 = vector.broadcast %160 : vector<16x1xbf16> to vector<16x16xbf16>
    %163 = vector.broadcast %161 : vector<1x16xbf16> to vector<16x16xbf16>
    %164 = arith.addf %162, %163 : vector<16x16xbf16>
    %cst_33 = arith.constant 0.000000e+00 : bf16
    %165 = vector.broadcast %cst_33 : bf16 to vector<16x16xbf16>
    %166 = arith.cmpf ogt, %164, %165 : vector<16x16xbf16>
    %cst_34 = arith.constant 2.001950e-01 : bf16
    %167 = vector.broadcast %cst_34 : bf16 to vector<16x16xbf16>
    %168 = arith.mulf %167, %164 : vector<16x16xbf16>
    %169 = arith.select %166, %164, %168 : vector<16x16xi1>, vector<16x16xbf16>
    %170 = arith.addf %169, %0 : vector<16x16xbf16>
    %cst_35 = arith.constant dense<0xFF80> : vector<16xbf16>
    %171 = vector.multi_reduction <maximumf>, %170, %cst_35 [1] : vector<16x16xbf16> to vector<16xbf16>
    %172 = vector.shape_cast %171 : vector<16xbf16> to vector<16x1xbf16>
    %173 = vector.broadcast %172 : vector<16x1xbf16> to vector<16x16xbf16>
    %174 = arith.subf %170, %173 : vector<16x16xbf16>
    %175 = math.exp %174 : vector<16x16xbf16>
    %176 = vector.extract_strided_slice %6 {offsets = [0, 24], sizes = [16, 4], strides = [1, 1]} : vector<16x32xbf16> to vector<16x4xbf16>
    %177 = tpu.concatenate %176, %15 in 1 : vector<16x4xbf16>, vector<16x1xbf16> -> vector<16x5xbf16>
    %cst_36 = arith.constant dense<0.000000e+00> : vector<16x5xf32>
    %178 = tpu.matmul %175, %177, %cst_36 {dimension_numbers = #tpu.dot_dimension_numbers<[1], [0], [0], [1], [0, 0, 1, 1], [], []>} : vector<16x16xbf16>, vector<16x5xbf16>, vector<16x5xf32> -> vector<16x5xf32>
    %179 = vector.extract_strided_slice %178 {offsets = [0, 0], sizes = [16, 4], strides = [1, 1]} : vector<16x5xf32> to vector<16x4xf32>
    %180 = vector.extract_strided_slice %178 {offsets = [0, 4], sizes = [16, 1], strides = [1, 1]} : vector<16x5xf32> to vector<16x1xf32>
    %181 = tpu.reciprocal %180 {approx = true} : vector<16x1xf32> -> vector<16x1xf32>
    %182 = vector.broadcast %181 : vector<16x1xf32> to vector<16x4xf32>
    %183 = arith.mulf %179, %182 : vector<16x4xf32>
    %184 = vector.extract_strided_slice %14 {offsets = [0, 7], sizes = [16, 1], strides = [1, 1]} : vector<16x8xbf16> to vector<16x1xbf16>
    %185 = vector.extract_strided_slice %12 {offsets = [7, 0], sizes = [1, 16], strides = [1, 1]} : vector<8x16xbf16> to vector<1x16xbf16>
    %186 = vector.broadcast %184 : vector<16x1xbf16> to vector<16x16xbf16>
    %187 = vector.broadcast %185 : vector<1x16xbf16> to vector<16x16xbf16>
    %188 = arith.addf %186, %187 : vector<16x16xbf16>
    %cst_37 = arith.constant 0.000000e+00 : bf16
    %189 = vector.broadcast %cst_37 : bf16 to vector<16x16xbf16>
    %190 = arith.cmpf ogt, %188, %189 : vector<16x16xbf16>
    %cst_38 = arith.constant 2.001950e-01 : bf16
    %191 = vector.broadcast %cst_38 : bf16 to vector<16x16xbf16>
    %192 = arith.mulf %191, %188 : vector<16x16xbf16>
    %193 = arith.select %190, %188, %192 : vector<16x16xi1>, vector<16x16xbf16>
    %194 = arith.addf %193, %0 : vector<16x16xbf16>
    %cst_39 = arith.constant dense<0xFF80> : vector<16xbf16>
    %195 = vector.multi_reduction <maximumf>, %194, %cst_39 [1] : vector<16x16xbf16> to vector<16xbf16>
    %196 = vector.shape_cast %195 : vector<16xbf16> to vector<16x1xbf16>
    %197 = vector.broadcast %196 : vector<16x1xbf16> to vector<16x16xbf16>
    %198 = arith.subf %194, %197 : vector<16x16xbf16>
    %199 = math.exp %198 : vector<16x16xbf16>
    %200 = vector.extract_strided_slice %6 {offsets = [0, 28], sizes = [16, 4], strides = [1, 1]} : vector<16x32xbf16> to vector<16x4xbf16>
    %201 = tpu.concatenate %200, %15 in 1 : vector<16x4xbf16>, vector<16x1xbf16> -> vector<16x5xbf16>
    %cst_40 = arith.constant dense<0.000000e+00> : vector<16x5xf32>
    %202 = tpu.matmul %199, %201, %cst_40 {dimension_numbers = #tpu.dot_dimension_numbers<[1], [0], [0], [1], [0, 0, 1, 1], [], []>} : vector<16x16xbf16>, vector<16x5xbf16>, vector<16x5xf32> -> vector<16x5xf32>
    %203 = vector.extract_strided_slice %202 {offsets = [0, 0], sizes = [16, 4], strides = [1, 1]} : vector<16x5xf32> to vector<16x4xf32>
    %204 = vector.extract_strided_slice %202 {offsets = [0, 4], sizes = [16, 1], strides = [1, 1]} : vector<16x5xf32> to vector<16x1xf32>
    %205 = tpu.reciprocal %204 {approx = true} : vector<16x1xf32> -> vector<16x1xf32>
    %206 = vector.broadcast %205 : vector<16x1xf32> to vector<16x4xf32>
    %207 = arith.mulf %203, %206 : vector<16x4xf32>
    %208 = tpu.concatenate %39, %63, %87, %111, %135, %159, %183, %207 in 1 : vector<16x4xf32>, vector<16x4xf32>, vector<16x4xf32>, vector<16x4xf32>, vector<16x4xf32>, vector<16x4xf32>, vector<16x4xf32>, vector<16x4xf32> -> vector<16x32xf32>
    %c0_41 = arith.constant 0 : index
    %c0_42 = arith.constant 0 : index
    %209 = vector.load %arg4[%c0_41, %c0_42] : memref<1x32xf32, #tpu.memory_space<vmem>>, vector<1x32xf32>
    %210 = vector.broadcast %209 : vector<1x32xf32> to vector<16x32xf32>
    %211 = arith.addf %208, %210 : vector<16x32xf32>
    %c0_43 = arith.constant 0 : index
    %c0_44 = arith.constant 0 : index
    %212 = vector.load %arg5[%c0_43, %c0_44] : memref<32x32xf32, #tpu.memory_space<vmem>>, vector<32x32xf32>
    %213 = arith.truncf %212 : vector<32x32xf32> to vector<32x32xbf16>
    %214 = arith.truncf %211 : vector<16x32xf32> to vector<16x32xbf16>
    %cst_45 = arith.constant dense<0.000000e+00> : vector<16x32xf32>
    %215 = tpu.matmul %214, %213, %cst_45 {dimension_numbers = #tpu.dot_dimension_numbers<[1], [0], [0], [1], [0, 0, 1, 1], [], []>} : vector<16x32xbf16>, vector<32x32xbf16>, vector<16x32xf32> -> vector<16x32xf32>
    %216 = arith.truncf %215 : vector<16x32xf32> to vector<16x32xbf16>
    %c0_46 = arith.constant 0 : index
    %c0_47 = arith.constant 0 : index
    %217 = vector.load %arg6[%c0_46, %c0_47] : memref<32x2xf32, #tpu.memory_space<vmem>>, vector<32x2xf32>
    %218 = arith.truncf %217 : vector<32x2xf32> to vector<32x2xbf16>
    %cst_48 = arith.constant dense<0.000000e+00> : vector<16x2xf32>
    %219 = tpu.matmul %216, %218, %cst_48 {dimension_numbers = #tpu.dot_dimension_numbers<[1], [0], [0], [1], [0, 0, 1, 1], [], []>} : vector<16x32xbf16>, vector<32x2xbf16>, vector<16x2xf32> -> vector<16x2xf32>
    %220 = vector.extract_strided_slice %219 {offsets = [0, 0], sizes = [16, 1], strides = [1, 1]} : vector<16x2xf32> to vector<16x1xf32>
    %221 = tpu.transpose %220, [1, 0] : vector<16x1xf32> -> vector<1x16xf32>
    %222 = arith.truncf %221 : vector<1x16xf32> to vector<1x16xbf16>
    %223 = vector.extract_strided_slice %219 {offsets = [0, 1], sizes = [16, 1], strides = [1, 1]} : vector<16x2xf32> to vector<16x1xf32>
    %224 = arith.truncf %223 : vector<16x1xf32> to vector<16x1xbf16>
    %cst_49 = arith.constant 1.000000e+00 : bf16
    %225 = vector.broadcast %cst_49 : bf16 to vector<16x1xbf16>
    %226 = vector.broadcast %224 : vector<16x1xbf16> to vector<16x16xbf16>
    %227 = vector.broadcast %222 : vector<1x16xbf16> to vector<16x16xbf16>
    %228 = arith.addf %226, %227 : vector<16x16xbf16>
    %cst_50 = arith.constant 0.000000e+00 : bf16
    %229 = vector.broadcast %cst_50 : bf16 to vector<16x16xbf16>
    %230 = arith.cmpf ogt, %228, %229 : vector<16x16xbf16>
    %cst_51 = arith.constant 2.001950e-01 : bf16
    %231 = vector.broadcast %cst_51 : bf16 to vector<16x16xbf16>
    %232 = arith.mulf %231, %228 : vector<16x16xbf16>
    %233 = arith.select %230, %228, %232 : vector<16x16xi1>, vector<16x16xbf16>
    %234 = arith.addf %233, %0 : vector<16x16xbf16>
    %cst_52 = arith.constant dense<0xFF80> : vector<16xbf16>
    %235 = vector.multi_reduction <maximumf>, %234, %cst_52 [1] : vector<16x16xbf16> to vector<16xbf16>
    %236 = vector.shape_cast %235 : vector<16xbf16> to vector<16x1xbf16>
    %237 = vector.broadcast %236 : vector<16x1xbf16> to vector<16x16xbf16>
    %238 = arith.subf %234, %237 : vector<16x16xbf16>
    %239 = math.exp %238 : vector<16x16xbf16>
    %240 = tpu.concatenate %216, %225 in 1 : vector<16x32xbf16>, vector<16x1xbf16> -> vector<16x33xbf16>
    %cst_53 = arith.constant dense<0.000000e+00> : vector<16x33xf32>
    %241 = tpu.matmul %239, %240, %cst_53 {dimension_numbers = #tpu.dot_dimension_numbers<[1], [0], [0], [1], [0, 0, 1, 1], [], []>} : vector<16x16xbf16>, vector<16x33xbf16>, vector<16x33xf32> -> vector<16x33xf32>
    %242 = vector.extract_strided_slice %241 {offsets = [0, 0], sizes = [16, 32], strides = [1, 1]} : vector<16x33xf32> to vector<16x32xf32>
    %243 = vector.extract_strided_slice %241 {offsets = [0, 32], sizes = [16, 1], strides = [1, 1]} : vector<16x33xf32> to vector<16x1xf32>
    %244 = tpu.reciprocal %243 {approx = true} : vector<16x1xf32> -> vector<16x1xf32>
    %245 = vector.broadcast %244 : vector<16x1xf32> to vector<16x32xf32>
    %246 = arith.mulf %242, %245 : vector<16x32xf32>
    %c0_54 = arith.constant 0 : index
    %c0_55 = arith.constant 0 : index
    %247 = vector.load %arg7[%c0_54, %c0_55] : memref<1x32xf32, #tpu.memory_space<vmem>>, vector<1x32xf32>
    %248 = vector.broadcast %247 : vector<1x32xf32> to vector<16x32xf32>
    %249 = arith.addf %246, %248 : vector<16x32xf32>
    %c0_56 = arith.constant 0 : index
    %c0_57 = arith.constant 0 : index
    %250 = vector.load %arg8[%c0_56, %c0_57] : memref<16x32xf32, #tpu.memory_space<vmem>>, vector<16x32xf32>
    tpu.vector_store %arg8[%c0_56, %c0_57], %249 {strides = array<i32>} : memref<16x32xf32, #tpu.memory_space<vmem>>, vector<16x32xf32>,
    return
  }
}

</mosaic_0001>

<bundles_post_ra>
// kernel: tpu_custom_call.1
= control target key start
LH: loop header
LB: loop body
LE: loop exit
PB: predicated region body
PF: predicated region fallthrough
CT: control target
= control target key end

     0   :  { %13 = vsyncpa [#allocation3], 0  ;;  %s1974_s0 = inlined_call_operand.vmem [shape: f32[16,32], index: 0, kind: input, shape index: {}]   ;;  %s1975_s1 = inlined_call_operand.hbm [shape: bf16[16,16], index: 1, kind: input, shape index: {}]   ;;  %s1976_s2 = inlined_call_operand.vmem [shape: f32[32,32], index: 2, kind: input, shape index: {}]   ;;  %s1977_s3 = inlined_call_operand.vmem [shape: f32[32,16], index: 3, kind: input, shape index: {}]   ;;  %s1978_s4 = inlined_call_operand.vmem [shape: f32[1,32], index: 4, kind: input, shape index: {}]   ;;  %s1979_s5 = inlined_call_operand.vmem [shape: f32[32,32], index: 5, kind: input, shape index: {}]   ;;  %s1980_s6 = inlined_call_operand.vmem [shape: f32[32,2], index: 6, kind: input, shape index: {}]   ;;  %s1981_s7 = inlined_call_operand.vmem [shape: f32[1,32], index: 7, kind: input, shape index: {}]   ;;  %s1982_s8 = inlined_call_operand.hbm [shape: f32[16,32], index: 8, kind: output, shape index: {}]  }
   0x1   :  { %14 = vsyncpa [#allocation4], 0  ;;  %s21_s29 = sshll.u32 %s1975_s1, 4  ;;  %s1446_s30 = smov [#allocation2]   ;;  %s22_s29 = int_to_ptr.hbm [resolvable:$true] %s21_s29 }
   0x2   :  { %s23_s9 = sshll.u32 %s1446_s30, 4  ;;  %s1447_s10 = smov 64   ;;  %s24_s9 = int_to_ptr.vmem [resolvable:$true] %s23_s9 }
   0x3   :  { %s1448_s11 = smov 4  }
   0x4   :  { %29 = dma.hbm_to_vmem [thread:$0]  %s22_s29, 128, %s24_s9, [#allocation3], %s1447_s10, %s1447_s10, %s1448_s11  }
   0x5   :  { %1442 = dma.done.wait [#allocation3], 128  }
   0x6   :  { %1443 = vsyncadd [#allocation3], 4294967168  ;;  %v54_v0 = vld [vmem:[%s1976_s2 + $0x10] sm:$0xff]  ;;  %v55_v1 = vld [vmem:[%s1976_s2 + $0x18] sm:$0xff]  ;;  %vm59_vm0 = vcmask 261120   ;;  %vm214_vm1 = vcmask 31744  }
   0x7   :  { %v52_v2 = vld [vmem:[%s1976_s2] sm:$0xff]  ;;  %v57_v3 = vpack.c.bf16 %v55_v1, %v54_v0  ;;  %v53_v4 = vld [vmem:[%s1976_s2 + $0x8] sm:$0xff]  ;;  %v81_v9 = vld [vmem:[%s1977_s3 + $0x10] sm:$0xff]  ;;  %v1449_v23 = vmov 10   ;;  %v1450_v24 = vmov 9   ;;  %v1451_v25 = vmov 8  }
   0x8   :  { %v56_v5 = vpack.c.bf16 %v53_v4, %v52_v2  ;;  %v50_v6 = vld [vmem:[%s1974_s0] sm:$0xff]  ;;  %v51_v7 = vld [vmem:[%s1974_s0 + $0x8] sm:$0xff]  ;;  %v82_v10 = vld [vmem:[%s1977_s3 + $0x18] sm:$0xff]  ;;  %1301 = vset.pattern.permute.xlu2 %v1449_v23  ;;  %1300 = vset.pattern.permute.xlu1 %v1450_v24  ;;  %v1452_v30 = vmov 11   ;;  %v1453_v31 = vmov 14   ;;  %v1454_v32 = vmov 15  }
   0x9   :  { %69 = vmatpush.bf16.msra.mxu0 %v57_v3  ;;  %v58_v8 = vpack.c.bf16 %v51_v7, %v50_v6  ;;  %v84_v11 = vpack.c.bf16 %v82_v10, %v81_v9  ;;  %v79_v12 = vld [vmem:[%s1977_s3] sm:$0xff]  ;;  %v80_v13 = vld [vmem:[%s1977_s3 + $0x8] sm:$0xff]  ;;  %1299 = vset.pattern.permute.xlu0 %v1451_v25  ;;  %v1455_v33 = vmov 12   ;;  %v1456_v34 = vmov 13   ;;  %s1457_s3 = smov 124   ;;  %s1458_s29 = smov 104  }
   0xa   :  { %v83_v14 = vpack.c.bf16 %v80_v13, %v79_v12  ;;  %s1459_s30 = smov 120   ;;  %s1460_s9 = smov 116   ;;  %v1461_v53 = vmov 839922192   ;;  %vm193_vm6 = vcmask 130048  }
   0xb   :  { %99 = vmatpush.bf16.msra.mxu1 %v84_v11  ;;  %v148_v54 = vunpack.c.l.s4 %v1461_v53  ;;  %s1462_s10 = smov 100   ;;  %s1463_s12 = smov 108  }
   0xc   :  { %s1464_s13 = smov 112   ;;  %s1466_s14 = smov 16  }
   0xd   :  { %70 = vmatpush.bf16.msra.mxu0 %v56_v5  ;;  %v1576_v56 = vunpack.c.0.s8 %v148_v54  ;;  %s1467_s15 = smov 20   ;;  %s1468_s16 = smov 8  }
   0xe   :  { %s1469_s1 = smov 12   ;;  %s1470_s17 = smov 28  }
   0xf   :  { %100 = vmatpush.bf16.msra.mxu1 %v83_v14  ;;  %s1471_s18 = smov 24  }
  0x10   :  { %1251 = vmatmul.msk.bf16.vlgmr.msra.gmra.mxu0 %vm59_vm0, %v58_v8 }
  0x8d   :  { %v72_v15 = vpop.f32.mrf.mxu0 }
  0x8e   :  { %v77_v16 = vpack.c.bf16 %v72_v15, %v72_v15  ;;  %v1265_v15 = vld [vmem:[#allocation2] sm:$0xff]  }
  0x90   :  { %v87_v19 = vunpack.c.l.b16 %v77_v16 }
  0x95   :  { %v74_v17 = vpop.f32.mrf.mxu0 }
  0x96   :  { %v78_v18 = vpack.c.bf16 %v74_v17, %v74_v17 }
  0x98   :  { %v88_v20 = vunpack.c.l.b16 %v78_v18 }
  0x9a   :  { %v1556_v21 = vpack.c.b16 %v88_v20, %v87_v19 }
  0x9c   :  { %1252 = vmatmul.msk.bf16.vlgmr.msra.gmra.mxu1 %vm59_vm0, %v1556_v21  ;;  %v216_v22 = vsel %vm214_vm1, %v1556_v21, 1065369472 }
  0x9d   :  { %228 = vmatpush.bf16.msra.mxu2 %v216_v22 }
 0x119   :  { %v102_v26 = vpop.f32.mrf.mxu1 }
 0x11a   :  { %v140_v27 = vpack.c.bf16 %v102_v26, %v102_v26 }
 0x11c   :  { %353 = vperm.xlu2 %1301, %v140_v27   ;;  %250 = vperm.xlu1 %1300, %v140_v27  }
 0x11d   :  { %144 = vperm.xlu0 %1299, %v140_v27  }
 0x121   :  { %v104_v28 = vpop.f32.mrf.mxu1 }
 0x122   :  { %v141_v29 = vpack.c.bf16 %v104_v28, %v104_v28 }
 0x124   :  { %361 = vperm.xlu2 %1301, %v141_v29   ;;  %258 = vperm.xlu1 %1300, %v141_v29  }
 0x125   :  { %1302 = vset.pattern.permute.xlu0 %v1452_v30 }
 0x126   :  { %453 = vperm.xlu0 %1302, %v140_v27  }
 0x12c   :  { %1304 = vset.pattern.permute.xlu1 %v1453_v31 }
 0x12d   :  { %753 = vperm.xlu1 %1304, %v140_v27  }
 0x12e   :  { %1303 = vset.pattern.permute.xlu0 %v1451_v25 }
 0x12f   :  { %153 = vperm.xlu0 %1303, %v141_v29  }
 0x135   :  { %1305 = vset.pattern.permute.xlu1 %v1454_v32 }
 0x136   :  { %853 = vperm.xlu1 %1305, %v140_v27  }
 0x137   :  { %1306 = vset.pattern.permute.xlu0 %v1455_v33 }
 0x138   :  { %553 = vperm.xlu0 %1306, %v140_v27  }
 0x13e   :  { %1307 = vset.pattern.permute.xlu1 %v1456_v34 }
 0x13f   :  { %653 = vperm.xlu1 %1307, %v140_v27  }
 0x140   :  { %1309 = vset.pattern.permute.xlu0 %v1453_v31 }
 0x141   :  { %761 = vperm.xlu0 %1309, %v141_v29  }
 0x147   :  { %1308 = vset.pattern.permute.xlu1 %v1452_v30 }
 0x148   :  { %461 = vperm.xlu1 %1308, %v141_v29  }
 0x149   :  { %316 = vrot.lane.b32.xlu0 %v1556_v21, %s1457_s3 }
 0x14a   :  { %107 = vxpose.xlu2.b32.start [1/2] (short) (narrow) %v102_v26, 8 }
 0x150   :  { %1310 = vset.pattern.permute.xlu1 %v1454_v32  ;;  %v1606_v32 = vunpack.c.h.bf16 %v1265_v15 }
 0x151   :  { %816 = vrot.lane.b32.xlu0 %v1556_v21, %s1458_s29  ;;  %861 = vperm.xlu1 %1310, %v141_v29  }
 0x152   :  { %108 = vxpose.xlu2.b32.end [2/2] (short) (narrow) %v104_v28, 8  ;;  %v1601_v28 = vunpack.c.l.bf16 %v1265_v15 }
 0x159   :  { %1311 = vset.pattern.permute.xlu1 %v1455_v33 }
 0x15a   :  { %561 = vperm.xlu1 %1311, %v141_v29  }
 0x162   :  { %416 = vrot.lane.b32.xlu1 %v1556_v21, %s1459_s30 }
 0x176   :  { %v354_v50 = vpop.permute.xlu2 %353 }
 0x177   :  { %v359_v57 = vperm.slane %v354_v50, %v1576_v56 }
 0x179   :  { %v369_v5 = vunpack.c.l.bf16 %v359_v57 }
 0x17e   :  { %v362_v55 = vpop.permute.xlu2 %361 }
 0x17f   :  { %v367_v58 = vperm.slane %v362_v55, %v1576_v56 }
 0x181   :  { %v1589_v7 = vunpack.c.l.bf16 %v367_v58 }
 0x18e   :  { %v251_v35 = vpop.permute.xlu1 %250 }
 0x18f   :  { %v145_v36 = vpop.permute.xlu0 %144  ;;  %v256_v59 = vperm.slane %v251_v35, %v1576_v56 }
 0x190   :  { %v150_v60 = vperm.slane %v145_v36, %v1576_v56 }
 0x191   :  { %v269_v8 = vunpack.c.l.bf16 %v256_v59 }
 0x192   :  { %v164_v9 = vunpack.c.l.bf16 %v150_v60 }
 0x196   :  { %v259_v37 = vpop.permute.xlu1 %258 }
 0x197   :  { %v264_v61 = vperm.slane %v259_v37, %v1576_v56 }
 0x198   :  { %v454_v38 = vpop.permute.xlu0 %453 }
 0x199   :  { %v459_v62 = vperm.slane %v454_v38, %v1576_v56  ;;  %v1591_v10 = vunpack.c.l.bf16 %v264_v61 }
 0x19b   :  { %v1593_v11 = vunpack.c.l.bf16 %v459_v62 }
 0x19f   :  { %v754_v39 = vpop.permute.xlu1 %753 }
 0x1a0   :  { %v759_v63 = vperm.slane %v754_v39, %v1576_v56 }
 0x1a1   :  { %v154_v40 = vpop.permute.xlu0 %153 }
 0x1a2   :  { %v159_v0 = vperm.slane %v154_v40, %v1576_v56  ;;  %v769_v12 = vunpack.c.l.bf16 %v759_v63 }
 0x1a4   :  { %v165_v16 = vunpack.c.l.bf16 %v159_v0 }
 0x1a8   :  { %v854_v41 = vpop.permute.xlu1 %853 }
 0x1a9   :  { %v859_v1 = vperm.slane %v854_v41, %v1576_v56 }
 0x1aa   :  { %v554_v42 = vpop.permute.xlu0 %553 }
 0x1ab   :  { %v559_v2 = vperm.slane %v554_v42, %v1576_v56  ;;  %v869_v17 = vunpack.c.l.bf16 %v859_v1 }
 0x1ad   :  { %v569_v18 = vunpack.c.l.bf16 %v559_v2 }
 0x1b1   :  { %v654_v43 = vpop.permute.xlu1 %653 }
 0x1b2   :  { %v659_v3 = vperm.slane %v654_v43, %v1576_v56 }
 0x1b3   :  { %v1565_v44 = vpop.permute.xlu0 %761 }
 0x1b4   :  { %1312 = vset.pattern.permute.xlu2 %v1456_v34  ;;  %v669_v19 = vunpack.c.l.bf16 %v659_v3  ;;  %v767_v25 = vperm.slane %v1565_v44, %v1576_v56 }
 0x1ba   :  { %v1567_v45 = vpop.permute.xlu1 %461 }
 0x1bb   :  { %v317_v46 = vpop.permute.xlu0 %316  ;;  %661 = vperm.xlu2 %1312, %v141_v29   ;;  %v467_v26 = vperm.slane %v1567_v45, %v1576_v56 }
 0x1bc   :  { %v319_v47 = vsel %vm214_vm1, %v317_v46, 1065369472 }
 0x1bd   :  { %331 = vmatpush.bf16.msra.mxu3 %v319_v47 }
 0x1c3   :  { %516 = vrot.lane.b32.xlu2 %v1556_v21, %s1460_s9  ;;  %v1571_v48 = vpop.permute.xlu1 %861 }
 0x1cc   :  { %v1573_v49 = vpop.permute.xlu1 %561 }
 0x1d4   :  { %v417_v51 = vpop.permute.xlu1 %416 }
 0x1d5   :  { %v419_v52 = vsel %vm214_vm1, %v417_v51, 1065369472 }
 0x1d6   :  { %431 = vmatpush.bf16.msrb.mxu2 %v419_v52 }
 0x1e3   :  { %v123_v4 = vpop.trf.xlu2 }
 0x1e4   :  { %v139_v6 = vpack.c.bf16 %v123_v4, %v123_v4 }
 0x1e6   :  { %v161_v13 = vpack.i.b16 %v139_v6, %v139_v6  ;;  %v265_v14 = vshrl.u32 %v139_v6, 16 }
 0x1e8   :  { %v163_v20 = vperm.slane %v161_v13, 0  ;;  %v1595_v22 = vpack.i.b16 %v265_v14, %v265_v14  ;;  %v368_v23 = vperm.slane %v161_v13, 1  ;;  %v568_v24 = vperm.slane %v161_v13, 2 }
 0x1e9   :  { %v768_v27 = vperm.slane %v161_v13, 3 }
 0x1ea   :  { %v166_v29 = vunpack.c.l.bf16 %v163_v20  ;;  %v268_v30 = vperm.slane %v1595_v22, 0  ;;  %v1604_v31 = vunpack.c.l.bf16 %v368_v23  ;;  %v1608_v33 = vunpack.c.l.bf16 %v568_v24 }
 0x1eb   :  { %v1610_v34 = vunpack.c.l.bf16 %v768_v27  ;;  %v868_v35 = vperm.slane %v1595_v22, 3  ;;  %v668_v36 = vperm.slane %v1595_v22, 2  ;;  %v468_v38 = vperm.slane %v1595_v22, 1 }
 0x1ec   :  { %v1614_v37 = vunpack.c.l.bf16 %v268_v30  ;;  %v167_v39 = vadd.f32 %v166_v29, %v164_v9  ;;  %v168_v40 = vadd.f32 %v166_v29, %v165_v16  ;;  %v572_v43 = vadd.f32 %v1608_v33, %v569_v18 }
 0x1ed   :  { %v1617_v41 = vunpack.c.l.bf16 %v868_v35  ;;  %v772_v42 = vadd.f32 %v1610_v34, %v769_v12  ;;  %v372_v46 = vadd.f32 %v1604_v31, %v369_v5  ;;  %v1623_v52 = vunpack.c.l.bf16 %v668_v36 }
 0x1ee   :  { %v169_v47 = vpack.c.bf16 %v167_v39, %v167_v39  ;;  %v272_v50 = vadd.f32 %v1614_v37, %v269_v8  ;;  %v170_v51 = vpack.c.bf16 %v168_v40, %v168_v40  ;;  %v574_v54 = vpack.c.bf16 %v572_v43, %v572_v43 }
 0x1ef   :  { %v774_v53 = vpack.c.bf16 %v772_v42, %v772_v42  ;;  %v872_v55 = vadd.f32 %v1617_v41, %v869_v17  ;;  %v1626_v57 = vpack.c.bf16 %v372_v46, %v372_v46  ;;  %v672_v61 = vadd.f32 %v1623_v52, %v669_v19 }
 0x1f0   :  { %v171_v58 = vunpack.c.l.bf16 %v169_v47  ;;  %v274_v59 = vpack.c.bf16 %v272_v50, %v272_v50  ;;  %v172_v60 = vunpack.c.l.bf16 %v170_v51  ;;  %v576_v63 = vunpack.c.l.bf16 %v574_v54 }
 0x1f1   :  { %v776_v62 = vunpack.c.l.bf16 %v774_v53  ;;  %v874_v0 = vpack.c.bf16 %v872_v55, %v872_v55  ;;  %v376_v1 = vunpack.c.l.bf16 %v1626_v57  ;;  %v273_v44 = vadd.f32 %v1614_v37, %v1591_v10 }
 0x1f2   :  { %vm1630_vm2 = vcmp.gt.f32.partialorder %v171_v58, 0.0  ;;  %v175_v3 = vmul.f32 0.20019531, %v171_v58  ;;  %v276_v4 = vunpack.c.l.bf16 %v274_v59  ;;  %vm1634_vm3 = vcmp.gt.f32.partialorder %v172_v60, 0.0 }
 0x1f3   :  { %vm1638_vm4 = vcmp.gt.f32.partialorder %v776_v62, 0.0  ;;  %v780_v8 = vmul.f32 0.20019531, %v776_v62  ;;  %vm1642_vm5 = vcmp.gt.f32.partialorder %v576_v63, 0.0  ;;  %v580_v12 = vmul.f32 0.20019531, %v576_v63  ;;  %vm179_vm7 = vmpackc.low %vm1630_vm2, %vm1630_vm2 }
 0x1f4   :  { %v177_v13 = vpack.c.bf16 %v175_v3, %v175_v3  ;;  %v876_v14 = vunpack.c.l.bf16 %v874_v0  ;;  %vm1649_vm8 = vcmp.gt.f32.partialorder %v276_v4, 0.0  ;;  %v280_v16 = vmul.f32 0.20019531, %v276_v4  ;;  %vm784_vm9 = vmpackc.low %vm1638_vm4, %vm1638_vm4 }
 0x1f5   :  { %v782_v17 = vpack.c.bf16 %v780_v8, %v780_v8  ;;  %v582_v18 = vpack.c.bf16 %v580_v12, %v580_v12  ;;  %v176_v19 = vmul.f32 0.20019531, %v172_v60  ;;  %vm1656_vm10 = vcmp.gt.f32.partialorder %v376_v1, 0.0  ;;  %vm584_vm11 = vmpackc.low %vm1642_vm5, %vm1642_vm5 }
 0x1f6   :  { %v181_v23 = vsel %vm179_vm7, %v169_v47, %v177_v13  ;;  %vm1663_vm12 = vcmp.gt.f32.partialorder %v876_v14, 0.0  ;;  %v880_v27 = vmul.f32 0.20019531, %v876_v14  ;;  %v282_v29 = vpack.c.bf16 %v280_v16, %v280_v16  ;;  %vm284_vm13 = vmpackc.low %vm1649_vm8, %vm1649_vm8 }
 0x1f7   :  { %v786_v30 = vsel %vm784_vm9, %v774_v53, %v782_v17  ;;  %v586_v35 = vsel %vm584_vm11, %v574_v54, %v582_v18  ;;  %v183_v36 = vunpack.c.l.bf16 %v181_v23  ;;  %v178_v39 = vpack.c.bf16 %v176_v19, %v176_v19  ;;  %vm180_vm14 = vmpackc.low %vm1634_vm3, %vm1634_vm3 }
 0x1f8   :  { %v788_v40 = vunpack.c.l.bf16 %v786_v30  ;;  %v588_v42 = vunpack.c.l.bf16 %v586_v35  ;;  %v882_v43 = vpack.c.bf16 %v880_v27, %v880_v27  ;;  %v286_v46 = vsel %vm284_vm13, %v274_v59, %v282_v29  ;;  %vm884_vm15 = vmpackc.low %vm1663_vm12, %vm1663_vm12 }
 0x1f9   :  { %v187_v47 = vadd.f32 %v1601_v28, %v183_v36  ;;  %v288_v50 = vunpack.c.l.bf16 %v286_v46  ;;  %v182_v53 = vsel %vm180_vm14, %v170_v51, %v178_v39  ;;  %v380_v54 = vmul.f32 0.20019531, %v376_v1  ;;  %vm384_vm2 = vmpackc.low %vm1656_vm10, %vm1656_vm10 }
 0x1fa   :  { %v790_v55 = vadd.f32 %v1601_v28, %v788_v40  ;;  %v590_v58 = vadd.f32 %v1601_v28, %v588_v42  ;;  %v886_v60 = vsel %vm884_vm15, %v874_v0, %v882_v43  ;;  %v184_v62 = vunpack.c.l.bf16 %v182_v53 }
 0x1fb   :  { %v189_v59 = vpack.c.bf16 %v187_v47, %v187_v47  ;;  %v888_v63 = vunpack.c.l.bf16 %v886_v60  ;;  %v290_v2 = vadd.f32 %v1601_v28, %v288_v50  ;;  %v382_v3 = vpack.c.bf16 %v380_v54, %v380_v54 }
 0x1fc   :  { %v471_v4 = vunpack.c.l.bf16 %v468_v38  ;;  %v792_v5 = vpack.c.bf16 %v790_v55, %v790_v55  ;;  %v592_v6 = vpack.c.bf16 %v590_v58, %v590_v58  ;;  %v1685_v51 = vpack.c.bf16 %v672_v61, %v672_v61 }
 0x1fd   :  { %v1687_v1 = vunpack.c.l.bf16 %v189_v59  ;;  %v890_v0 = vadd.f32 %v1601_v28, %v888_v63  ;;  %v292_v8 = vpack.c.bf16 %v290_v2, %v290_v2  ;;  %v386_v9 = vsel %vm384_vm2, %v1626_v57, %v382_v3 }
 0x1fe   :  { %v867_v12 = vperm.slane %v1571_v48, %v1576_v56  ;;  %v1693_v22 = vunpack.c.l.bf16 %v792_v5  ;;  %v1695_v38 = vunpack.c.l.bf16 %v592_v6  ;;  %v388_v13 = vunpack.c.l.bf16 %v386_v9 }
 0x1ff   :  { %v194_v14 = vsel %vm193_vm6, %v1687_v1, -inf  ;;  %v892_v61 = vpack.c.bf16 %v890_v0, %v890_v0  ;;  %v1699_v15 = vunpack.c.l.bf16 %v292_v8  ;;  %v188_v16 = vadd.f32 %v1606_v32, %v184_v62 }
 0x200   :  { %v770_v57 = vunpack.c.l.bf16 %v767_v25  ;;  %v796_v48 = vsel %vm193_vm6, %v1693_v22, -inf  ;;  %v596_v17 = vsel %vm193_vm6, %v1695_v38, -inf  ;;  %195 = vmax.xlane.f32.xlu0 %v194_v14  ;;  %v676_v18 = vunpack.c.l.bf16 %v1685_v51 }
 0x201   :  { %v470_v19 = vunpack.c.l.bf16 %v467_v26  ;;  %797 = vmax.xlane.f32.xlu1 %v796_v48  ;;  %597 = vmax.xlane.f32.xlu2 %v596_v17  ;;  %v390_v20 = vadd.f32 %v1601_v28, %v388_v13  ;;  %v472_v25 = vadd.f32 %v471_v4, %v1593_v11  ;;  %v870_v23 = vunpack.c.l.bf16 %v867_v12 }
 0x202   :  { %v567_v24 = vperm.slane %v1573_v49, %v1576_v56  ;;  %v1719_v27 = vunpack.c.l.bf16 %v892_v61  ;;  %v373_v29 = vadd.f32 %v1604_v31, %v1589_v7  ;;  %v296_v45 = vsel %vm193_vm6, %v1699_v15, -inf }
 0x203   :  { %v190_v26 = vpack.c.bf16 %v188_v16, %v188_v16  ;;  %v275_v30 = vpack.c.bf16 %v273_v44, %v273_v44  ;;  %v474_v35 = vpack.c.bf16 %v472_v25, %v472_v25  ;;  %v680_v39 = vmul.f32 0.20019531, %v676_v18 }
 0x204   :  { %v375_v36 = vpack.c.bf16 %v373_v29, %v373_v29  ;;  %v473_v10 = vadd.f32 %v471_v4, %v470_v19  ;;  %v873_v11 = vadd.f32 %v1617_v41, %v870_v23  ;;  %v392_v37 = vpack.c.bf16 %v390_v20, %v390_v20 }
 0x205   :  { %v277_v40 = vunpack.c.l.bf16 %v275_v30  ;;  %v476_v42 = vunpack.c.l.bf16 %v474_v35  ;;  %vm1726_vm3 = vcmp.gt.f32.partialorder %v676_v18, 0.0  ;;  %v896_v7 = vsel %vm193_vm6, %v1719_v27, -inf }
 0x206   :  { %v377_v31 = vunpack.c.l.bf16 %v375_v36  ;;  %v475_v43 = vpack.c.bf16 %v473_v10, %v473_v10  ;;  %v875_v46 = vpack.c.bf16 %v873_v11, %v873_v11  ;;  %v682_v55 = vpack.c.bf16 %v680_v39, %v680_v39  ;;  %vm684_vm10 = vmpackc.low %vm1726_vm3, %vm1726_vm3 }
 0x207   :  { %vm1732_vm4 = vcmp.gt.f32.partialorder %v277_v40, 0.0  ;;  %v281_v50 = vmul.f32 0.20019531, %v277_v40  ;;  %vm1736_vm5 = vcmp.gt.f32.partialorder %v476_v42, 0.0  ;;  %v480_v53 = vmul.f32 0.20019531, %v476_v42 }
 0x208   :  { %297 = vmax.xlane.f32.xlu0 %v296_v45  ;;  %v381_v54 = vmul.f32 0.20019531, %v377_v31  ;;  %v477_v58 = vunpack.c.l.bf16 %v475_v43  ;;  %v773_v60 = vadd.f32 %v1610_v34, %v770_v57  ;;  %vm285_vm7 = vmpackc.low %vm1732_vm4, %vm1732_vm4  ;;  %vm1744_vm8 = vcmp.gt.f32.partialorder %v377_v31, 0.0 }
 0x209   :  { %897 = vmax.xlane.f32.xlu1 %v896_v7  ;;  %v283_v62 = vpack.c.bf16 %v281_v50, %v281_v50  ;;  %v482_v59 = vpack.c.bf16 %v480_v53, %v480_v53  ;;  %v877_v2 = vunpack.c.l.bf16 %v875_v46  ;;  %v1748_v3 = vunpack.c.l.bf16 %v190_v26  ;;  %vm484_vm9 = vmpackc.low %vm1736_vm5, %vm1736_vm5 }
 0x20a   :  { %v1750_v4 = vunpack.c.l.bf16 %v392_v37  ;;  %v383_v34 = vpack.c.bf16 %v381_v54, %v381_v54  ;;  %v481_v0 = vmul.f32 0.20019531, %v477_v58  ;;  %vm385_vm11 = vmpackc.low %vm1744_vm8, %vm1744_vm8  ;;  %v686_v12 = vsel %vm684_vm10, %v1685_v51, %v682_v55 }
 0x20b   :  { %v287_v5 = vsel %vm285_vm7, %v275_v30, %v283_v62  ;;  %v486_v6 = vsel %vm484_vm9, %v474_v35, %v482_v59  ;;  %v570_v13 = vunpack.c.l.bf16 %v567_v24  ;;  %v881_v61 = vmul.f32 0.20019531, %v877_v2 }
 0x20c   :  { %v289_v8 = vunpack.c.l.bf16 %v287_v5  ;;  %v488_v9 = vunpack.c.l.bf16 %v486_v6  ;;  %v387_v14 = vsel %vm385_vm11, %v375_v36, %v383_v34  ;;  %v775_v16 = vpack.c.bf16 %v773_v60, %v773_v60 }
 0x20d   :  { %v197_v57 = vsel %vm193_vm6, %v1748_v3, -inf  ;;  %v396_v48 = vsel %vm193_vm6, %v1750_v4, -inf  ;;  %v688_v19 = vunpack.c.l.bf16 %v686_v12  ;;  %vm1768_vm12 = vcmp.gt.f32.partialorder %v477_v58, 0.0 }
 0x20e   :  { %v291_v17 = vadd.f32 %v1606_v32, %v289_v8  ;;  %v490_v18 = vadd.f32 %v1601_v28, %v488_v9  ;;  %v483_v51 = vpack.c.bf16 %v481_v0, %v481_v0  ;;  %vm1772_vm13 = vcmp.gt.f32.partialorder %v877_v2, 0.0  ;;  %vm485_vm14 = vmpackc.low %vm1768_vm12, %vm1768_vm12 }
 0x20f   :  { %v389_v24 = vunpack.c.l.bf16 %v387_v14  ;;  %v883_v29 = vpack.c.bf16 %v881_v61, %v881_v61  ;;  %v777_v45 = vunpack.c.l.bf16 %v775_v16  ;;  %v573_v26 = vadd.f32 %v1608_v33, %v570_v13  ;;  %vm885_vm15 = vmpackc.low %vm1772_vm13, %vm1772_vm13 }
 0x210   :  { %397 = vmax.xlane.f32.xlu0 %v396_v48  ;;  %v293_v25 = vpack.c.bf16 %v291_v17, %v291_v17  ;;  %v492_v23 = vpack.c.bf16 %v490_v18, %v490_v18  ;;  %v690_v35 = vadd.f32 %v1601_v28, %v688_v19  ;;  %v487_v10 = vsel %vm485_vm14, %v475_v43, %v483_v51 }
 0x211   :  { %198 = vmax.xlane.f32.xlu1 %v197_v57  ;;  %v391_v39 = vadd.f32 %v1606_v32, %v389_v24  ;;  %v887_v11 = vsel %vm885_vm15, %v875_v46, %v883_v29  ;;  %v781_v33 = vmul.f32 0.20019531, %v777_v45  ;;  %v575_v40 = vpack.c.bf16 %v573_v26, %v573_v26 }
 0x212   :  { %v1780_v30 = vunpack.c.l.bf16 %v492_v23  ;;  %v1786_v36 = vunpack.c.l.bf16 %v293_v25  ;;  %v692_v7 = vpack.c.bf16 %v690_v35, %v690_v35  ;;  %v489_v31 = vunpack.c.l.bf16 %v487_v10 }
 0x213   :  { %v889_v47 = vunpack.c.l.bf16 %v887_v11  ;;  %v393_v53 = vpack.c.bf16 %v391_v39, %v391_v39  ;;  %vm779_vm2 = vcmp.gt.f32.partialorder %v777_v45, 0.0  ;;  %v783_v43 = vpack.c.bf16 %v781_v33, %v781_v33  ;;  %v817_v33 = vpop.permute.xlu0 %816 }
 0x214   :  { %v496_v49 = vsel %vm193_vm6, %v1780_v30, -inf  ;;  %v299_v41 = vsel %vm193_vm6, %v1786_v36, -inf  ;;  %v577_v46 = vunpack.c.l.bf16 %v575_v40  ;;  %v1796_v55 = vunpack.c.l.bf16 %v692_v7  ;;  %vm785_vm3 = vmpackc.low %vm779_vm2, %vm779_vm2 }
 0x215   :  { %v662_v37 = vpop.permute.xlu2 %661  ;;  %v491_v58 = vadd.f32 %v1606_v32, %v489_v31  ;;  %v891_v60 = vadd.f32 %v1606_v32, %v889_v47  ;;  %v1800_v59 = vunpack.c.l.bf16 %v393_v53  ;;  %v787_v2 = vsel %vm785_vm3, %v775_v16, %v783_v43 }
 0x216   :  { %v667_v42 = vperm.slane %v662_v37, %v1576_v56  ;;  %v581_v34 = vmul.f32 0.20019531, %v577_v46  ;;  %v789_v13 = vunpack.c.l.bf16 %v787_v2  ;;  %vm579_vm5 = vcmp.gt.f32.partialorder %v577_v46, 0.0 }
 0x217   :  { %v493_v0 = vpack.c.bf16 %v491_v58, %v491_v58  ;;  %v893_v8 = vpack.c.bf16 %v891_v60, %v891_v60  ;;  %v399_v12 = vsel %vm193_vm6, %v1800_v59, -inf  ;;  %vm585_vm8 = vmpackc.low %vm579_vm5, %vm579_vm5  ;;  %vm1010_vm9 = vcmask 64512  }
 0x218   :  { %v670_v50 = vunpack.c.l.bf16 %v667_v42  ;;  %497 = vmax.xlane.f32.xlu0 %v496_v49  ;;  %v583_v14 = vpack.c.bf16 %v581_v34, %v581_v34  ;;  %v791_v48 = vadd.f32 %v1606_v32, %v789_v13  ;;  %vm1013_vm10 = vcmask 97280  }
 0x219   :  { %300 = vmax.xlane.f32.xlu1 %v299_v41  ;;  %916 = vrot.lane.b32.xlu2 %v1556_v21, %s1462_s10  ;;  %v1807_v16 = vunpack.c.l.bf16 %v893_v8  ;;  %v1809_v57 = vunpack.c.l.bf16 %v493_v0  ;;  %vm1018_vm11 = vcmask 162816   ;;  %vm1021_vm12 = vcmask 195584  }
 0x21a   :  { %v673_v54 = vadd.f32 %v1623_v52, %v670_v50  ;;  %v696_v52 = vsel %vm193_vm6, %v1796_v55, -inf  ;;  %v587_v19 = vsel %vm585_vm8, %v575_v40, %v583_v14  ;;  %v793_v25 = vpack.c.bf16 %v791_v48, %v791_v48 }
 0x21b   :  { %v899_v20 = vsel %vm193_vm6, %v1807_v16, -inf  ;;  %v499_v44 = vsel %vm193_vm6, %v1809_v57, -inf  ;;  %v589_v23 = vunpack.c.l.bf16 %v587_v19  ;;  %vm1024_vm13 = vcmask 228352  }
 0x21c   :  { %v675_v62 = vpack.c.bf16 %v673_v54, %v673_v54  ;;  %v1819_v45 = vunpack.c.l.bf16 %v793_v25 }
 0x21d   :  { %v517_v63 = vpop.permute.xlu2 %516  ;;  %v591_v26 = vadd.f32 %v1606_v32, %v589_v23 }
 0x21e   :  { %v677_v5 = vunpack.c.l.bf16 %v675_v62  ;;  %v519_v6 = vsel %vm214_vm1, %v517_v63, 1065369472  ;;  %v799_v39 = vsel %vm193_vm6, %v1819_v45, -inf }
 0x21f   :  { %531 = vmatpush.bf16.msrb.mxu3 %v519_v6  ;;  %v593_v10 = vpack.c.bf16 %v591_v26, %v591_v26  ;;  %v819_v26 = vsel %vm214_vm1, %v817_v33, 1065369472 }
 0x220   :  { %vm679_vm4 = vcmp.gt.f32.partialorder %v677_v5, 0.0  ;;  %v681_v9 = vmul.f32 0.20019531, %v677_v5  ;;  %697 = vmax.xlane.f32.xlu0 %v696_v52 }
 0x221   :  { %400 = vmax.xlane.f32.xlu1 %v399_v12  ;;  %vm685_vm7 = vmpackc.low %vm679_vm4, %vm679_vm4  ;;  %v1826_v11 = vunpack.c.l.bf16 %v593_v10 }
 0x222   :  { %v683_v61 = vpack.c.bf16 %v681_v9, %v681_v9 }
 0x223   :  { %v599_v37 = vsel %vm193_vm6, %v1826_v11, -inf }
 0x224   :  { %v687_v17 = vsel %vm685_vm7, %v675_v62, %v683_v61 }
 0x225   :  { %v689_v18 = vunpack.c.l.bf16 %v687_v17 }
 0x227   :  { %v691_v51 = vadd.f32 %v1606_v32, %v689_v18 }
 0x228   :  { %900 = vmax.xlane.f32.xlu0 %v899_v20 }
 0x229   :  { %500 = vmax.xlane.f32.xlu1 %v499_v44  ;;  %v693_v24 = vpack.c.bf16 %v691_v51, %v691_v51 }
 0x22b   :  { %v1817_v29 = vunpack.c.l.bf16 %v693_v24 }
 0x22d   :  { %v699_v35 = vsel %vm193_vm6, %v1817_v29, -inf }
 0x230   :  { %700 = vmax.xlane.f32.xlu0 %v699_v35 }
 0x231   :  { %800 = vmax.xlane.f32.xlu1 %v799_v39 }
 0x239   :  { %600 = vmax.xlane.f32.xlu1 %v599_v37 }
 0x244   :  { %716 = vrot.lane.b32.xlu0 %v1556_v21, %s1463_s12 }
 0x252   :  { %616 = vrot.lane.b32.xlu1 %v1556_v21, %s1464_s13  ;;  %s1238_s13 = sshll.u32 %s1982_s8, 4  ;;  %s1239_s13 = int_to_ptr.hbm [resolvable:$true] %s1238_s13 }
 0x273   :  { %v196_v40 = vpop.xlane.xlu0 %195 }
 0x274   :  { %v1832_v42 = vpop.xlane.xlu1 %797  ;;  %v200_v31 = vpack.c.bf16 %v196_v40, %v196_v40  ;;  %v1840_v18 = vpop.xlane.xlu2 %597 }
 0x276   :  { %v202_v41 = vunpack.c.l.bf16 %v200_v31 }
 0x278   :  { %v204_v46 = vsub.f32 %v1687_v1, %v202_v41 }
 0x27b   :  { %v298_v49 = vpop.xlane.xlu0 %297 }
 0x27c   :  { %v1834_v7 = vpop.xlane.xlu1 %897  ;;  %v302_v54 = vpack.c.bf16 %v298_v49, %v298_v49 }
 0x27d   :  { %v902_v33 = vpack.c.bf16 %v1834_v7, %v1834_v7 }
 0x27e   :  { %v304_v63 = vunpack.c.l.bf16 %v302_v54 }
 0x280   :  { %v306_v9 = vsub.f32 %v1699_v15, %v304_v63 }
 0x283   :  { %v398_v47 = vpop.xlane.xlu0 %397 }
 0x284   :  { %v199_v50 = vpop.xlane.xlu1 %198  ;;  %v402_v8 = vpack.c.bf16 %v398_v47, %v398_v47 }
 0x285   :  { %v201_v53 = vpack.c.bf16 %v199_v50, %v199_v50 }
 0x287   :  { %v203_v43 = vunpack.c.l.bf16 %v201_v53 }
 0x289   :  { %v205_v58 = vsub.f32 %v1748_v3, %v203_v43  ;;  %v404_v3 = vunpack.c.l.bf16 %v402_v8  ;;  %v802_v43 = vpack.c.bf16 %v1832_v42, %v1832_v42  ;;  %v904_v42 = vunpack.c.l.bf16 %v902_v33 }
 0x28b   :  { %v206_v60 = vpack.c.bf16 %v205_v58, %v204_v46  ;;  %v498_v21 = vpop.xlane.xlu0 %497  ;;  %v406_v15 = vsub.f32 %v1750_v4, %v404_v3  ;;  %v917_v46 = vpop.permute.xlu2 %916 }
 0x28c   :  { %v301_v62 = vpop.xlane.xlu1 %300  ;;  %v502_v23 = vpack.c.bf16 %v498_v21, %v498_v21  ;;  %v919_v63 = vsel %vm214_vm1, %v917_v46, 1065369472 }
 0x28d   :  { %v207_v2 = vunpack.c.l.bf16 %v206_v60  ;;  %v208_v34 = vunpack.c.h.bf16 %v206_v60  ;;  %v303_v5 = vpack.c.bf16 %v301_v62, %v301_v62 }
 0x28e   :  { %v504_v37 = vunpack.c.l.bf16 %v502_v23 }
 0x28f   :  { %v209_v6 = vmul.f32 1.442695, %v207_v2  ;;  %v211_v52 = vmul.f32 1.442695, %v208_v34  ;;  %v305_v0 = vunpack.c.l.bf16 %v303_v5 }
 0x290   :  { %v506_v58 = vsub.f32 %v1780_v30, %v504_v37 }
 0x291   :  { %1322 = vpow2.f32 %v209_v6  ;;  %v307_v12 = vsub.f32 %v1786_v36, %v305_v0 }
 0x292   :  { %1324 = vpow2.f32 %v211_v52  ;;  %v804_v52 = vunpack.c.l.bf16 %v802_v43 }
 0x293   :  { %v308_v1 = vpack.c.bf16 %v307_v12, %v306_v9  ;;  %v698_v13 = vpop.xlane.xlu0 %697 }
 0x294   :  { %v401_v14 = vpop.xlane.xlu1 %400  ;;  %v702_v54 = vpack.c.bf16 %v698_v13, %v698_v13 }
 0x295   :  { %v309_v61 = vunpack.c.l.bf16 %v308_v1  ;;  %v310_v48 = vunpack.c.h.bf16 %v308_v1  ;;  %v403_v17 = vpack.c.bf16 %v401_v14, %v401_v14 }
 0x296   :  { %v704_v5 = vunpack.c.l.bf16 %v702_v54 }
 0x297   :  { %v1323_v19 = vpop.eup %1322  ;;  %v311_v20 = vmul.f32 1.442695, %v309_v61  ;;  %v313_v51 = vmul.f32 1.442695, %v310_v48  ;;  %v405_v44 = vunpack.c.l.bf16 %v403_v17  ;;  %v602_v61 = vpack.c.bf16 %v1840_v18, %v1840_v18 }
 0x298   :  { %v1325_v25 = vpop.eup %1324  ;;  %v906_v48 = vsub.f32 %v1719_v27, %v904_v42  ;;  %v706_v17 = vsub.f32 %v1796_v55, %v704_v5 }
 0x299   :  { %1326 = vpow2.f32 %v311_v20  ;;  %v407_v36 = vsub.f32 %v1800_v59, %v405_v44  ;;  %v213_v24 = vpack.c.bf16 %v1325_v25, %v1323_v19  ;;  %v806_v20 = vsub.f32 %v1693_v22, %v804_v52 }
 0x29a   :  { %1328 = vpow2.f32 %v313_v51  ;;  %v604_v27 = vunpack.c.l.bf16 %v602_v61 }
 0x29b   :  { %v408_v35 = vpack.c.bf16 %v407_v36, %v406_v15  ;;  %1253 = vmatmul.msk.bf16.vlgmr.msra.gmra.mxu2 %vm193_vm6, %v213_v24  ;;  %v901_v39 = vpop.xlane.xlu0 %900 }
 0x29c   :  { %831 = vmatpush.bf16.msra.mxu2 %v819_v26  ;;  %v501_v10 = vpop.xlane.xlu1 %500  ;;  %v903_v47 = vpack.c.bf16 %v901_v39, %v901_v39 }
 0x29d   :  { %v409_v40 = vunpack.c.l.bf16 %v408_v35  ;;  %v410_v49 = vunpack.c.h.bf16 %v408_v35  ;;  %v503_v31 = vpack.c.bf16 %v501_v10, %v501_v10 }
 0x29e   :  { %v905_v62 = vunpack.c.l.bf16 %v903_v47 }
 0x29f   :  { %v1327_v4 = vpop.eup %1326  ;;  %v411_v50 = vmul.f32 1.442695, %v409_v40  ;;  %v413_v41 = vmul.f32 1.442695, %v410_v49  ;;  %v505_v53 = vunpack.c.l.bf16 %v503_v31  ;;  %v606_v31 = vsub.f32 %v1695_v38, %v604_v27 }
 0x2a0   :  { %v1329_v59 = vpop.eup %1328 }
 0x2a1   :  { %1330 = vpow2.f32 %v411_v50  ;;  %v507_v60 = vsub.f32 %v1809_v57, %v505_v53  ;;  %v315_v21 = vpack.c.bf16 %v1329_v59, %v1327_v4  ;;  %v907_v57 = vsub.f32 %v1807_v16, %v905_v62 }
 0x2a2   :  { %1332 = vpow2.f32 %v413_v41 }
 0x2a3   :  { %v508_v2 = vpack.c.bf16 %v507_v60, %v506_v58  ;;  %1254 = vmatmul.msk.bf16.vlgmr.msra.gmra.mxu3 %vm193_vm6, %v315_v21  ;;  %v701_v34 = vpop.xlane.xlu0 %700  ;;  %v908_v44 = vpack.c.bf16 %v907_v57, %v906_v48 }
 0x2a4   :  { %931 = vmatpush.bf16.msra.mxu3 %v919_v63  ;;  %v801_v7 = vpop.xlane.xlu1 %800  ;;  %v703_v6 = vpack.c.bf16 %v701_v34, %v701_v34 }
 0x2a5   :  { %v509_v0 = vunpack.c.l.bf16 %v508_v2  ;;  %v510_v30 = vunpack.c.h.bf16 %v508_v2  ;;  %v803_v8 = vpack.c.bf16 %v801_v7, %v801_v7  ;;  %v910_v49 = vunpack.c.h.bf16 %v908_v44 }
 0x2a6   :  { %v705_v9 = vunpack.c.l.bf16 %v703_v6 }
 0x2a7   :  { %v1331_v12 = vpop.eup %1330  ;;  %v511_v1 = vmul.f32 1.442695, %v509_v0  ;;  %v513_v13 = vmul.f32 1.442695, %v510_v30  ;;  %v805_v3 = vunpack.c.l.bf16 %v803_v8  ;;  %v913_v53 = vmul.f32 1.442695, %v910_v49 }
 0x2a8   :  { %v1333_v14 = vpop.eup %1332  ;;  %v707_v19 = vsub.f32 %v1817_v29, %v705_v9  ;;  %v909_v29 = vunpack.c.l.bf16 %v908_v44  ;;  %v1465_v30 = vmov 4  }
 0x2a9   :  { %1334 = vpow2.f32 %v511_v1  ;;  %v807_v16 = vsub.f32 %v1819_v45, %v805_v3  ;;  %v415_v51 = vpack.c.bf16 %v1333_v14, %v1331_v12  ;;  %1315 = vset.pattern.permute.xlu0 %v1465_v30  ;;  %1314 = vset.pattern.permute.xlu1 %v1465_v30 }
 0x2aa   :  { %1336 = vpow2.f32 %v513_v13  ;;  %v708_v25 = vpack.c.bf16 %v707_v19, %v706_v17  ;;  %v911_v50 = vmul.f32 1.442695, %v909_v29  ;;  %1313 = vset.pattern.permute.xlu2 %v1465_v30 }
 0x2ab   :  { %v808_v15 = vpack.c.bf16 %v807_v16, %v806_v20  ;;  %1255 = vmatmul.msk.bf16.vlgmr.msrb.gmra.mxu2 %vm193_vm6, %v415_v51 }
 0x2ac   :  { %v709_v23 = vunpack.c.l.bf16 %v708_v25  ;;  %v710_v18 = vunpack.c.h.bf16 %v708_v25  ;;  %v601_v36 = vpop.xlane.xlu1 %600 }
 0x2ad   :  { %v809_v24 = vunpack.c.l.bf16 %v808_v15  ;;  %v810_v55 = vunpack.c.h.bf16 %v808_v15  ;;  %v603_v26 = vpack.c.bf16 %v601_v36, %v601_v36 }
 0x2ae   :  { %v711_v35 = vmul.f32 1.442695, %v709_v23  ;;  %v713_v45 = vmul.f32 1.442695, %v710_v18 }
 0x2af   :  { %v1335_v22 = vpop.eup %1334  ;;  %v811_v39 = vmul.f32 1.442695, %v809_v24  ;;  %v813_v10 = vmul.f32 1.442695, %v810_v55  ;;  %v605_v37 = vunpack.c.l.bf16 %v603_v26 }
 0x2b0   :  { %v1337_v40 = vpop.eup %1336  ;;  %1338 = vpow2.f32 %v711_v35 }
 0x2b1   :  { %1340 = vpow2.f32 %v811_v39  ;;  %v607_v47 = vsub.f32 %v1826_v11, %v605_v37  ;;  %v515_v4 = vpack.c.bf16 %v1337_v40, %v1335_v22 }
 0x2b2   :  { %1342 = vpow2.f32 %v813_v10 }
 0x2b3   :  { %1344 = vpow2.f32 %v713_v45  ;;  %v608_v41 = vpack.c.bf16 %v607_v47, %v606_v31  ;;  %1256 = vmatmul.msk.bf16.vlgmr.msrb.gmra.mxu3 %vm193_vm6, %v515_v4 }
 0x2b4   :  { %1346 = vpow2.f32 %v911_v50 }
 0x2b5   :  { %v609_v59 = vunpack.c.l.bf16 %v608_v41  ;;  %v610_v33 = vunpack.c.h.bf16 %v608_v41  ;;  %1348 = vpow2.f32 %v913_v53 }
 0x2b6   :  { %v1339_v43 = vpop.eup %1338  ;;  %v717_v46 = vpop.permute.xlu0 %716 }
 0x2b7   :  { %v1341_v54 = vpop.eup %1340  ;;  %v719_v58 = vsel %vm214_vm1, %v717_v46, 1065369472  ;;  %v611_v60 = vmul.f32 1.442695, %v609_v59  ;;  %v613_v62 = vmul.f32 1.442695, %v610_v33 }
 0x2b8   :  { %v1343_v38 = vpop.eup %1342  ;;  %731 = vmatpush.bf16.msrb.mxu1 %v719_v58 }
 0x2b9   :  { %v1345_v11 = vpop.eup %1344  ;;  %v815_v21 = vpack.c.bf16 %v1343_v38, %v1341_v54  ;;  %1350 = vpow2.f32 %v611_v60 }
 0x2ba   :  { %v715_v63 = vpack.c.bf16 %v1345_v11, %v1339_v43  ;;  %v1347_v2 = vpop.eup %1346  ;;  %1352 = vpow2.f32 %v613_v62 }
 0x2bb   :  { %1259 = vmatmul.msk.bf16.vlgmr.msra.gmra.mxu2 %vm193_vm6, %v815_v21  ;;  %v1349_v34 = vpop.eup %1348 }
 0x2bc   :  { %1258 = vmatmul.msk.bf16.vlgmr.msrb.gmra.mxu1 %vm193_vm6, %v715_v63  ;;  %v915_v42 = vpack.c.bf16 %v1349_v34, %v1347_v2 }
 0x2bf   :  { %v1351_v5 = vpop.eup %1350 }
 0x2c0   :  { %v1353_v7 = vpop.eup %1352 }
 0x2c1   :  { %v615_v0 = vpack.c.bf16 %v1353_v7, %v1351_v5 }
 0x2c3   :  { %1260 = vmatmul.msk.bf16.vlgmr.msra.gmra.mxu3 %vm193_vm6, %v915_v42 }
 0x2c4   :  { %v617_v6 = vpop.permute.xlu1 %616 }
 0x2c5   :  { %v619_v52 = vsel %vm214_vm1, %v617_v6, 1065369472 }
 0x2c6   :  { %631 = vmatpush.bf16.msrb.mxu0 %v619_v52 }
 0x2c9   :  { %1257 = vmatmul.msk.bf16.vlgmr.msrb.gmra.mxu0 %vm193_vm6, %v615_v0 }
 0x31e   :  { %v1872_v8 = vpop.f32.mrf.mxu2 }
 0x326   :  { %v1874_v57 = vpop.f32.mrf.mxu3  ;;  %v1876_v9 = vpop.f32.mrf.mxu2 }
 0x327   :  { %1354 = vrcp.f32 %v1874_v57 }
 0x32d   :  { %v1355_v12 = vpop.eup %1354 }
 0x32e   :  { %342 = vperm.xlu0 %1315, %v1355_v12   ;;  %v1879_v1 = vpop.f32.mrf.mxu2  ;;  %v1881_v13 = vpop.f32.mrf.mxu3 }
 0x336   :  { %v1886_v14 = vpop.f32.mrf.mxu2  ;;  %v1888_v61 = vpop.f32.mrf.mxu3 }
 0x339   :  { %v1883_v3 = vpop.f32.mrf.mxu1 }
 0x33a   :  { %1356 = vrcp.f32 %v1883_v3 }
 0x33b   :  { %1358 = vrcp.f32 %v1879_v1 }
 0x33e   :  { %v1891_v17 = vpop.f32.mrf.mxu2  ;;  %v1893_v19 = vpop.f32.mrf.mxu3 }
 0x340   :  { %v1357_v48 = vpop.eup %1356 }
 0x341   :  { %742 = vperm.xlu1 %1314, %v1357_v48   ;;  %v1359_v16 = vpop.eup %1358  ;;  %v735_v51 = vpop.f32.mrf.mxu1 }
 0x346   :  { %v633_v20 = vpop.f32.mrf.mxu0  ;;  %v1896_v25 = vpop.f32.mrf.mxu2 }
 0x347   :  { %1360 = vrcp.f32 %v633_v20  ;;  %v933_v24 = vpop.f32.mrf.mxu3 }
 0x348   :  { %1362 = vrcp.f32 %v1893_v19 }
 0x349   :  { %442 = vperm.xlu1 %1314, %v1359_v16  }
 0x34d   :  { %v1361_v44 = vpop.eup %1360 }
 0x34e   :  { %v1898_v15 = vpop.f32.mrf.mxu0  ;;  %v1363_v23 = vpop.eup %1362  ;;  %642 = vperm.xlu2 %1313, %v1361_v44  }
 0x34f   :  { %1364 = vrcp.f32 %v1898_v15  ;;  %v935_v35 = vpop.f32.mrf.mxu3 }
 0x350   :  { %1366 = vrcp.f32 %v735_v51 }
 0x351   :  { %547 = vperm.xlu1 %1314, %v1363_v23   ;;  %1368 = vrcp.f32 %v1896_v25 }
 0x352   :  { %1370 = vrcp.f32 %v1888_v61 }
 0x353   :  { %1372 = vrcp.f32 %v1881_v13 }
 0x354   :  { %1374 = vrcp.f32 %v1872_v8 }
 0x355   :  { %v1365_v18 = vpop.eup %1364  ;;  %1376 = vrcp.f32 %v1891_v17 }
 0x356   :  { %v1367_v36 = vpop.eup %1366  ;;  %647 = vperm.xlu0 %1315, %v1365_v18   ;;  %1378 = vrcp.f32 %v1886_v14 }
 0x357   :  { %v1369_v27 = vpop.eup %1368  ;;  %747 = vperm.xlu2 %1313, %v1367_v36   ;;  %1380 = vrcp.f32 %v935_v35 }
 0x358   :  { %v1371_v55 = vpop.eup %1370  ;;  %1382 = vrcp.f32 %v933_v24 }
 0x359   :  { %847 = vperm.xlu1 %1314, %v1369_v27   ;;  %v1373_v26 = vpop.eup %1372  ;;  %1384 = vrcp.f32 %v1876_v9 }
 0x35a   :  { %v1375_v29 = vpop.eup %1374 }
 0x35b   :  { %v1377_v22 = vpop.eup %1376 }
 0x35c   :  { %v1379_v39 = vpop.eup %1378 }
 0x35d   :  { %v1381_v10 = vpop.eup %1380 }
 0x35e   :  { %542 = vperm.xlu0 %1315, %v1371_v55   ;;  %v1383_v45 = vpop.eup %1382 }
 0x35f   :  { %347 = vperm.xlu2 %1313, %v1373_v26   ;;  %v1385_v37 = vpop.eup %1384 }
 0x361   :  { %239 = vperm.xlu1 %1314, %v1375_v29  }
 0x366   :  { %842 = vperm.xlu0 %1315, %v1377_v22  }
 0x367   :  { %447 = vperm.xlu2 %1313, %v1379_v39  }
 0x36e   :  { %947 = vperm.xlu0 %1315, %v1381_v10  }
 0x36f   :  { %942 = vperm.xlu2 %1313, %v1383_v45  }
 0x377   :  { %244 = vperm.xlu2 %1313, %v1385_v37  }
 0x3a0   :  { %v343_v31 = vpop.permute.xlu0 %342 }
 0x3a1   :  { %v350_v4 = vmul.f32 %v343_v31, %v1874_v57 }
 0x3a8   :  { %v643_v40 = vpop.permute.xlu2 %642 }
 0x3a9   :  { %v650_v49 = vmul.f32 %v643_v40, %v633_v20  ;;  %v1320_v40 = vld [vmem:[%s1978_s4] ss:$0 sm:$0xff] }
 0x3ab   :  { %978 = vrot.lane.b32.xlu0 %v650_v49, %s1466_s14 }
 0x3b1   :  { %v748_v47 = vpop.permute.xlu2 %747 }
 0x3b2   :  { %v751_v59 = vmul.f32 %v748_v47, %v735_v51 }
 0x3b3   :  { %v743_v50 = vpop.permute.xlu1 %742  ;;  %954 = vrot.lane.b32.xlu0 %v350_v4, %s1448_s11 }
 0x3b4   :  { %v750_v41 = vmul.f32 %v743_v50, %v1883_v3 }
 0x3b6   :  { %986 = vrot.lane.b32.xlu2 %v750_v41, %s1467_s15 }
 0x3b9   :  { %v348_v53 = vpop.permute.xlu2 %347 }
 0x3ba   :  { %v351_v34 = vmul.f32 %v348_v53, %v1881_v13  ;;  %v1036_v13 = vld [vmem:[%s1979_s5 + $0x18] sm:$0xff] }
 0x3bb   :  { %v443_v43 = vpop.permute.xlu1 %442  ;;  %988 = vrot.lane.b32.xlu0 %v751_v59, %s1467_s15 }
 0x3bc   :  { %v450_v33 = vmul.f32 %v443_v43, %v1879_v1  ;;  %v1035_v1 = vld [vmem:[%s1979_s5 + $0x10] sm:$0xff] }
 0x3bd   :  { %v1038_v3 = vpack.c.bf16 %v1036_v13, %v1035_v1  ;;  %v1061_v43 = vld [vmem:[%s1980_s6 + $0x10] sm:$0xff] }
 0x3be   :  { %962 = vrot.lane.b32.xlu2 %v450_v33, %s1468_s16  ;;  %v1062_v33 = vld [vmem:[%s1980_s6 + $0x18] sm:$0xff] }
 0x3bf   :  { %1049 = vmatpush.bf16.msra.mxu0 %v1038_v3 }
 0x3c1   :  { %v448_v46 = vpop.permute.xlu2 %447 }
 0x3c2   :  { %v451_v54 = vmul.f32 %v448_v46, %v1886_v14  ;;  %v1059_v46 = vld [vmem:[%s1980_s6] sm:$0xff] }
 0x3c3   :  { %v548_v58 = vpop.permute.xlu1 %547 }
 0x3c4   :  { %v551_v38 = vmul.f32 %v548_v58, %v1893_v19  ;;  %964 = vrot.lane.b32.xlu0 %v451_v54, %s1468_s16  ;;  %v1034_v19 = vld [vmem:[%s1979_s5 + $0x8] sm:$0xff]  ;;  %v1064_v54 = vpack.c.bf16 %v1062_v33, %v1061_v43 }
 0x3c5   :  { %v1060_v58 = vld [vmem:[%s1980_s6 + $0x8] sm:$0xff] }
 0x3c6   :  { %972 = vrot.lane.b32.xlu2 %v551_v38, %s1469_s1  ;;  %1079 = vmatpush.bf16.msra.mxu1 %v1064_v54  ;;  %v1063_v38 = vpack.c.bf16 %v1060_v58, %v1059_v46  ;;  %v1473_v58 = vmov 32  }
 0x3c8   :  { %v648_v11 = vpop.permute.xlu0 %647 }
 0x3c9   :  { %v943_v60 = vpop.permute.xlu2 %942  ;;  %v651_v21 = vmul.f32 %v648_v11, %v1898_v15 }
 0x3ca   :  { %v950_v62 = vmul.f32 %v943_v60, %v933_v24  ;;  %1080 = vmatpush.bf16.msra.mxu1 %v1063_v38 }
 0x3cb   :  { %v848_v63 = vpop.permute.xlu1 %847  ;;  %980 = vrot.lane.b32.xlu1 %v651_v21, %s1466_s14  ;;  %s1474_s14 = smov [#allocation5]  }
 0x3cc   :  { %v851_v2 = vmul.f32 %v848_v63, %v1896_v25  ;;  %1002 = vrot.lane.b32.xlu0 %v950_v62, %s1470_s17  ;;  %s1236_s15 = sshll.u32 %s1474_s14, 4  ;;  %s1237_s15 = int_to_ptr.vmem [resolvable:$true] %s1236_s15 }
 0x3ce   :  { %996 = vrot.lane.b32.xlu2 %v851_v2, %s1471_s18 }
 0x3d0   :  { %v543_v42 = vpop.permute.xlu0 %542 }
 0x3d1   :  { %v550_v5 = vmul.f32 %v543_v42, %v1888_v61  ;;  %v245_v12 = vpop.permute.xlu2 %244 }
 0x3d2   :  { %v248_v25 = vmul.f32 %v245_v12, %v1876_v9 }
 0x3d3   :  { %956 = vrot.lane.b32.xlu1 %v351_v34, %s1448_s11  ;;  %v240_v57 = vpop.permute.xlu1 %239 }
 0x3d4   :  { %v247_v15 = vmul.f32 %v240_v57, %v1872_v8 }
 0x3d8   :  { %v843_v7 = vpop.permute.xlu0 %842 }
 0x3d9   :  { %v850_v6 = vmul.f32 %v843_v7, %v1891_v17  ;;  %v1033_v17 = vld [vmem:[%s1979_s5] sm:$0xff] }
 0x3da   :  { %v1037_v20 = vpack.c.bf16 %v1034_v19, %v1033_v17 }
 0x3db   :  { %970 = vrot.lane.b32.xlu1 %v550_v5, %s1469_s1  ;;  %v1472_v5 = vmov 1   ;;  %s1475_s1 = smov 128  }
 0x3dc   :  { %1050 = vmatpush.bf16.msra.mxu0 %v1037_v20  ;;  %1316 = vset.pattern.permute.xlu2 %v1472_v5 }
 0x3dd   :  { %1317 = vset.pattern.permute.xlu0 %v1472_v5 }
 0x3e0   :  { %v948_v52 = vpop.permute.xlu0 %947 }
 0x3e1   :  { %v951_v0 = vmul.f32 %v948_v52, %v935_v35 }
 0x3e3   :  { %994 = vrot.lane.b32.xlu1 %v850_v6, %s1471_s18 }
 0x3eb   :  { %1004 = vrot.lane.b32.xlu1 %v951_v0, %s1470_s17 }
 0x410   :  { %v987_v48 = vpop.permute.xlu2 %986 }
 0x418   :  { %v963_v44 = vpop.permute.xlu2 %962 }
 0x41d   :  { %v979_v30 = vpop.permute.xlu0 %978 }
 0x420   :  { %v973_v26 = vpop.permute.xlu2 %972 }
 0x425   :  { %v955_v14 = vpop.permute.xlu0 %954 }
 0x426   :  { %v1008_v18 = vsel %vm214_vm1, %v247_v15, %v955_v14 }
 0x427   :  { %v1011_v55 = vsel %vm1010_vm9, %v1008_v18, %v963_v44 }
 0x428   :  { %v997_v49 = vpop.permute.xlu2 %996 }
 0x42d   :  { %v989_v51 = vpop.permute.xlu0 %988 }
 0x436   :  { %v965_v27 = vpop.permute.xlu0 %964 }
 0x43d   :  { %v981_v61 = vpop.permute.xlu1 %980 }
 0x43e   :  { %v1003_v37 = vpop.permute.xlu0 %1002 }
 0x445   :  { %v957_v16 = vpop.permute.xlu1 %956 }
 0x446   :  { %v1009_v36 = vsel %vm214_vm1, %v248_v25, %v957_v16 }
 0x447   :  { %v1012_v24 = vsel %vm1010_vm9, %v1009_v36, %v965_v27 }
 0x448   :  { %v1015_v35 = vsel %vm1013_vm10, %v1012_v24, %v973_v26 }
 0x449   :  { %v1017_v9 = vsel %vm193_vm6, %v1015_v35, %v981_v61 }
 0x44a   :  { %v1020_v45 = vsel %vm1018_vm11, %v1017_v9, %v989_v51 }
 0x44b   :  { %v1023_v4 = vsel %vm1021_vm12, %v1020_v45, %v997_v49 }
 0x44d   :  { %v971_v23 = vpop.permute.xlu1 %970 }
 0x44e   :  { %v1014_v29 = vsel %vm1013_vm10, %v1011_v55, %v971_v23 }
 0x44f   :  { %v1016_v22 = vsel %vm193_vm6, %v1014_v29, %v979_v30 }
 0x450   :  { %v1019_v8 = vsel %vm1018_vm11, %v1016_v22, %v987_v48 }
 0x455   :  { %v995_v39 = vpop.permute.xlu1 %994 }
 0x456   :  { %v1022_v10 = vsel %vm1021_vm12, %v1019_v8, %v995_v39 }
 0x457   :  { %v1025_v31 = vsel %vm1024_vm13, %v1022_v10, %v1003_v37 }
 0x458   :  { %v1031_v41 = vadd.f32 %v1320_v40, %v1025_v31 }
 0x45d   :  { %v1005_v47 = vpop.permute.xlu1 %1004 }
 0x45e   :  { %v1026_v50 = vsel %vm1024_vm13, %v1023_v4, %v1005_v47 }
 0x45f   :  { %v1032_v53 = vadd.f32 %v1320_v40, %v1026_v50 }
 0x461   :  { %v1039_v59 = vpack.c.bf16 %v1032_v53, %v1031_v41 }
 0x463   :  { %1261 = vmatmul.msk.bf16.vlgmr.msra.gmra.mxu0 %vm59_vm0, %v1039_v59 }
 0x4e0   :  { %v1052_v11 = vpop.f32.mrf.mxu0 }
 0x4e1   :  { %v1057_v60 = vpack.c.bf16 %v1052_v11, %v1052_v11 }
 0x4e3   :  { %v1067_v63 = vunpack.c.l.b16 %v1057_v60 }
 0x4e8   :  { %v1054_v21 = vpop.f32.mrf.mxu0 }
 0x4e9   :  { %v1058_v62 = vpack.c.bf16 %v1054_v21, %v1054_v21 }
 0x4eb   :  { %v1068_v2 = vunpack.c.l.b16 %v1058_v62  ;;  %v1321_v62 = vld [vmem:[%s1981_s7] ss:$0 sm:$0xff] }
 0x4ed   :  { %v1069_v34 = vpack.c.b16 %v1068_v2, %v1067_v63 }
 0x4ef   :  { %1262 = vmatmul.msk.bf16.vlgmr.msra.gmra.mxu1 %vm59_vm0, %v1069_v34  ;;  %v1191_v42 = vsel %vm59_vm0, %v1069_v34, 1065369472 }
 0x4f0   :  { %1203 = vmatpush.bf16.msrb.mxu2 %v1191_v42 }
 0x56c   :  { %v1082_v7 = vpop.f32.mrf.mxu1 }
 0x56d   :  { %v1120_v6 = vpack.c.bf16 %v1082_v7, %v1082_v7  ;;  %1087 = vxpose.xlu1.b32.start [1/2] (short) (narrow) %v1082_v7, 8 }
 0x56f   :  { %1124 = vperm.xlu2 %1316, %v1120_v6  }
 0x574   :  { %v1084_v52 = vpop.f32.mrf.mxu1 }
 0x575   :  { %v1121_v0 = vpack.c.bf16 %v1084_v52, %v1084_v52  ;;  %1088 = vxpose.xlu1.b32.end [2/2] (short) (narrow) %v1084_v52, 8 }
 0x577   :  { %1133 = vperm.xlu0 %1317, %v1121_v0   ;;  %1318 = vset.pattern.permute.xlu2 %v1473_v58 }
 0x57f   :  { %1319 = vset.pattern.permute.xlu0 %v1473_v58 }
 0x5c9   :  { %v1125_v30 = vpop.permute.xlu2 %1124 }
 0x5ca   :  { %v1130_v13 = vperm.slane %v1125_v30, %v1576_v56 }
 0x5cc   :  { %v1144_v48 = vunpack.c.l.bf16 %v1130_v13 }
 0x5e9   :  { %v1134_v57 = vpop.permute.xlu0 %1133 }
 0x5ea   :  { %v1139_v3 = vperm.slane %v1134_v57, %v1576_v56 }
 0x5ec   :  { %v1145_v17 = vunpack.c.l.bf16 %v1139_v3 }
 0x611   :  { %v1103_v12 = vpop.trf.xlu1 }
 0x612   :  { %v1119_v1 = vpack.c.bf16 %v1103_v12, %v1103_v12 }
 0x614   :  { %v1141_v14 = vpack.i.b16 %v1119_v1, %v1119_v1 }
 0x616   :  { %v1143_v61 = vperm.slane %v1141_v14, 0 }
 0x618   :  { %v1146_v19 = vunpack.c.l.bf16 %v1143_v61 }
 0x61a   :  { %v1147_v20 = vadd.f32 %v1146_v19, %v1144_v48  ;;  %v1148_v16 = vadd.f32 %v1146_v19, %v1145_v17 }
 0x61c   :  { %v1149_v51 = vpack.c.bf16 %v1147_v20, %v1147_v20  ;;  %v1150_v44 = vpack.c.bf16 %v1148_v16, %v1148_v16 }
 0x61e   :  { %v1151_v25 = vunpack.c.l.bf16 %v1149_v51  ;;  %v1152_v15 = vunpack.c.l.bf16 %v1150_v44 }
 0x620   :  { %vm1153_vm1 = vcmp.gt.f32.partialorder %v1151_v25, 0.0  ;;  %vm1154_vm14 = vcmp.gt.f32.partialorder %v1152_v15, 0.0  ;;  %v1155_v23 = vmul.f32 0.20019531, %v1151_v25  ;;  %v1156_v18 = vmul.f32 0.20019531, %v1152_v15 }
 0x621   :  { %vm1159_vm15 = vmpackc.low %vm1153_vm1, %vm1153_vm1 }
 0x622   :  { %v1157_v36 = vpack.c.bf16 %v1155_v23, %v1155_v23  ;;  %v1158_v27 = vpack.c.bf16 %v1156_v18, %v1156_v18  ;;  %vm1160_vm2 = vmpackc.low %vm1154_vm14, %vm1154_vm14 }
 0x624   :  { %v1161_v56 = vsel %vm1159_vm15, %v1149_v51, %v1157_v36  ;;  %v1162_v24 = vsel %vm1160_vm2, %v1150_v44, %v1158_v27 }
 0x625   :  { %v1163_v55 = vunpack.c.l.bf16 %v1161_v56  ;;  %v1164_v26 = vunpack.c.l.bf16 %v1162_v24 }
 0x627   :  { %v1165_v29 = vadd.f32 %v1601_v28, %v1163_v55  ;;  %v1166_v35 = vadd.f32 %v1606_v32, %v1164_v26 }
 0x629   :  { %v1167_v22 = vpack.c.bf16 %v1165_v29, %v1165_v29  ;;  %v1168_v39 = vpack.c.bf16 %v1166_v35, %v1166_v35 }
 0x62b   :  { %v1169_v9 = vunpack.c.l.bf16 %v1167_v22  ;;  %v1170_v8 = vunpack.c.l.bf16 %v1168_v39 }
 0x62d   :  { %v1171_v10 = vsel %vm193_vm6, %v1169_v9, -inf  ;;  %v1174_v45 = vsel %vm193_vm6, %v1170_v8, -inf }
 0x62e   :  { %1172 = vmax.xlane.f32.xlu2 %v1171_v10  ;;  %1175 = vmax.xlane.f32.xlu0 %v1174_v45 }
 0x6a1   :  { %v1173_v37 = vpop.xlane.xlu2 %1172  ;;  %v1176_v40 = vpop.xlane.xlu0 %1175 }
 0x6a2   :  { %v1177_v49 = vpack.c.bf16 %v1173_v37, %v1173_v37  ;;  %v1178_v31 = vpack.c.bf16 %v1176_v40, %v1176_v40 }
 0x6a4   :  { %v1179_v47 = vunpack.c.l.bf16 %v1177_v49  ;;  %v1180_v4 = vunpack.c.l.bf16 %v1178_v31 }
 0x6a6   :  { %v1181_v50 = vsub.f32 %v1169_v9, %v1179_v47  ;;  %v1182_v28 = vsub.f32 %v1170_v8, %v1180_v4 }
 0x6a8   :  { %v1183_v41 = vpack.c.bf16 %v1182_v28, %v1181_v50 }
 0x6aa   :  { %v1184_v32 = vunpack.c.l.bf16 %v1183_v41  ;;  %v1185_v53 = vunpack.c.h.bf16 %v1183_v41 }
 0x6ac   :  { %v1186_v59 = vmul.f32 1.442695, %v1184_v32  ;;  %v1188_v43 = vmul.f32 1.442695, %v1185_v53 }
 0x6ae   :  { %1386 = vpow2.f32 %v1186_v59 }
 0x6af   :  { %1388 = vpow2.f32 %v1188_v43 }
 0x6b4   :  { %v1387_v33 = vpop.eup %1386 }
 0x6b5   :  { %v1389_v46 = vpop.eup %1388 }
 0x6b6   :  { %v1190_v54 = vpack.c.bf16 %v1389_v46, %v1387_v33 }
 0x6b8   :  { %1263 = vmatmul.msk.bf16.vlgmr.msrb.gmra.mxu2 %vm193_vm6, %v1190_v54 }
 0x73b   :  { %v1205_v38 = vpop.f32.mrf.mxu2 }
 0x73c   :  { %1390 = vrcp.f32 %v1205_v38 }
 0x742   :  { %v1391_v11 = vpop.eup %1390 }
 0x743   :  { %1214 = vperm.xlu2 %1318, %v1391_v11   ;;  %v1207_v60 = vpop.f32.mrf.mxu2 }
 0x744   :  { %1392 = vrcp.f32 %v1207_v60 }
 0x74a   :  { %v1393_v21 = vpop.eup %1392 }
 0x74b   :  { %1219 = vperm.xlu0 %1319, %v1393_v21  }
 0x79d   :  { %v1215_v63 = vpop.permute.xlu2 %1214 }
 0x79e   :  { %v1222_v2 = vmul.f32 %v1215_v63, %v1205_v38 }
 0x7a0   :  { %v1228_v34 = vadd.f32 %v1321_v62, %v1222_v2 }
 0x7a2   :  { %1230 = vst.msk [vmem:[#allocation5] sm:$0xff] %vm59_vm0, %v1228_v34 }
 0x7bd   :  { %v1220_v42 = vpop.permute.xlu0 %1219 }
 0x7be   :  { %v1223_v5 = vmul.f32 %v1220_v42, %v1207_v60 }
 0x7c0   :  { %v1229_v7 = vadd.f32 %v1321_v62, %v1223_v5 }
 0x7c2   :  { %1231 = vst.msk [vmem:[#allocation5 + $0x8] sm:$0xff] %vm59_vm0, %v1229_v7 }
 0x7c3   :  { %1244 = dma.vmem_to_hbm [thread:$0]  %s1237_s15, 256, %s1239_s13, [#allocation4], %s1475_s1, %s1475_s1, %s1468_s16  }
 0x7c4   :  { %1444 = dma.done.wait [#allocation4], 256  }
 0x7c5   :  { %1445 = vsyncadd [#allocation4], 4294967040 }
 0x7c6   :  { %1249 = vsyncpa [#allocation3], 1 }
 0x7c7   :  { %1250 = vsyncpa [#allocation4], 1 }

</bundles_post_ra>
